<compile_context>
chip_gen: v5e
topology: v5e:2x2
jax: 0.10.0
libtpu: 0.0.40
codegen_flags: <defaults>
</compile_context>

<pallas_src>
import jax
import jax.numpy as jnp
from jax.experimental import pallas as pl
from jax.experimental.pallas import tpu as pltpu

_LANES = 128           # batch samples live on the lane axis
_HID_W = 3 * _LANES    # 384 : 3 hidden units, lane-dense
_OUT_W = 4 * _LANES    # 512 : interleaved (sample, feature) output lanes per row
_LHS_W = 9 * _LANES    # 1152: [t_hi | t_lo | t_hi] columns of the fused matmul


def _round_up(x, m):
    return (x + m - 1) // m * m


def _generator_kernel(params_ref, b2p_ref, w_ref, x_ref, o_ref):
    """Fused Generator forward on one lane-dense batch tile.

    params_ref: SMEM (8,)  f32  -- [0.5*w1 (3), 0.5*b1 (3), pad (2)]
    b2p_ref:    VMEM (1, 512) f32 -- folded layer-2 bias, pattern b2p[c] = b2'[c % 4]
    w_ref:      VMEM (1152, 512) bf16 -- layer-2 weights with the lane interleave
                baked in, hi/lo split: rows [0:384]=W_hi, [384:768]=W_hi, [768:1152]=W_lo
    x_ref:      VMEM (tile_r, 128) f32 -- batch samples on sublanes+lanes
    o_ref:      VMEM (tile_r, 512) f32 -- row r holds [y0..y3] for 128 samples,
                interleaved at stride 4 (matches a free reshape to (B, 4))
    """
    # --- hoist the six layer-1 scalars (single SMEM read each) ---------------
    w1_0 = params_ref[0]
    w1_1 = params_ref[1]
    w1_2 = params_ref[2]
    b1_0 = params_ref[3]
    b1_1 = params_ref[4]
    b1_2 = params_ref[5]

    x = x_ref[...]                                           # (tile_r, 128) f32

    # --- Layer 1 + sigmoid in tanh form (constants pre-folded: 0.5*w1, 0.5*b1)
    #     t[:, 128*j + l] = tanh(x[:, l] * 0.5*w1[j] + 0.5*b1[j])     (VPU + EUP)
    pre1 = jnp.concatenate(
        [x * w1_0 + b1_0, x * w1_1 + b1_1, x * w1_2 + b1_2], axis=-1)
    t = jnp.tanh(pre1)                                       # (tile_r, 384) f32

    # --- Exact two-term bf16 split so the MXU matmul reproduces f32 accuracy.
    t_hi = t.astype(jnp.bfloat16)
    t_lo = (t - t_hi.astype(jnp.float32)).astype(jnp.bfloat16)

    # --- Fused layer-2 contraction + (sample, feature) lane interleave (MXU):
    #     p[:, 4*l + k] = sum_j t[:, 128*j + l] * (0.25 * w2[j, k])
    lhs = jnp.concatenate([t_hi, t_lo, t_hi], axis=-1)       # (tile_r, 1152) bf16
    p = jnp.dot(lhs, w_ref[...], preferred_element_type=jnp.float32)

    # --- Output sigmoid in tanh form (bias already 0.5-folded in b2p).
    #     Unmasked, lane-dense (tile_r, 512) store, already interleaved.
    o_ref[...] = 0.5 * jnp.tanh(p + b2p_ref[...]) + 0.5


def generator_forward(x, w1, b1, w2, b2, *, max_tile_rows=1024):
    """Generator forward: x (B, 1) f32 -> (B, 4) f32.

    w1: (1, 3), b1: (3,), w2: (3, 4), b2: (4,)   (weights stored as (in, out)).
    """
    B = x.shape[0]

    # Lane-dense batch layout: B samples -> (rows, 128).  Pad only the lane tail
    # (and keep at least 8 rows so a single (8,128) tile is always full); the pad
    # is skipped entirely when B is already a multiple of 128 (and >= 1024).
    rows = max(pl.cdiv(B, _LANES), 8)
    pb = rows * _LANES
    xf = x.reshape(-1).astype(jnp.float32)
    if pb != B:
        xf = jnp.pad(xf, (0, pb - B))
    x_lane = xf.reshape(rows, _LANES)

    # ---- fold both sigmoids into tanh form and pack parameters --------------
    w1f = 0.5 * w1.reshape(3).astype(jnp.float32)
    b1f = 0.5 * b1.reshape(3).astype(jnp.float32)
    params = jnp.concatenate([w1f, b1f, jnp.zeros((2,), jnp.float32)])   # SMEM (8,)

    w2_f32 = w2.astype(jnp.float32)
    w2f = 0.25 * w2_f32                                                  # (3, 4)
    b2f = 0.5 * b2.astype(jnp.float32) + 0.25 * jnp.sum(w2_f32, axis=0)  # (4,)
    b2pat = jnp.tile(b2f, _LANES).reshape(1, _OUT_W)                     # (1, 512)

    # Layer-2 weight matrix with the stride-4 lane interleave baked in.
    # Row 128*j + l multiplies t_j at sample-lane l; column 4*l' + k is the
    # output for (sample-lane l', feature k); only l == l' entries are nonzero.
    w2f_hi = w2f.astype(jnp.bfloat16)
    w2f_lo = (w2f - w2f_hi.astype(jnp.float32)).astype(jnp.bfloat16)
    lane = jnp.arange(_OUT_W)
    sel = jnp.arange(_LANES)[:, None] == (lane[None, :] // 4)            # (128, 512)

    def _expand(wm):                                                     # (3,4)->(384,512)
        vals = wm.astype(jnp.float32)[:, lane % 4]                       # (3, 512)
        blk = jnp.where(sel[None, :, :], vals[:, None, :], 0.0)          # (3, 128, 512)
        return blk.reshape(_HID_W, _OUT_W)

    w_big = jnp.concatenate(
        [_expand(w2f_hi), _expand(w2f_hi), _expand(w2f_lo)],
        axis=0).astype(jnp.bfloat16)                                     # (1152, 512)

    # ---- tiling: big tiles, but at least two grid steps for v7x megacore ----
    tile_r = min(_round_up(max_tile_rows, 8), _round_up(rows, 8))
    if rows >= 16:
        tile_r = min(tile_r, _round_up(pl.cdiv(rows, 2), 8))
    n_tiles = pl.cdiv(rows, tile_r)   # ragged edge tile handled by Pallas masking

    out = pl.pallas_call(
        _generator_kernel,
        out_shape=jax.ShapeDtypeStruct((rows, _OUT_W), jnp.float32),
        grid=(n_tiles,),
        in_specs=[
            pl.BlockSpec(memory_space=pltpu.MemorySpace.SMEM),            # params (8,)
            pl.BlockSpec((1, _OUT_W), lambda i: (0, 0)),                  # b2 pattern
            pl.BlockSpec((_LHS_W, _OUT_W), lambda i: (0, 0)),             # fused W (resident)
            pl.BlockSpec((tile_r, _LANES), lambda i: (i, 0)),             # x tile
        ],
        out_specs=pl.BlockSpec((tile_r, _OUT_W), lambda i: (i, 0)),
        compiler_params=pltpu.CompilerParams(
            dimension_semantics=("parallel",),
            vmem_limit_bytes=32 * 1024 * 1024),
    )(params, b2pat, w_big, x_lane)

    # (rows, 512) -> (rows*128, 4) is a free, row-major reshape (the kernel already
    # interleaved features at stride 4); the [:B] slice is a no-op when B == rows*128.
    return out.reshape(pb, 4)[:B]


def _reference_forward(x, w1, b1, w2, b2):
    # Pure-f32 elementwise reference (no MXU, so no precision ambiguity).
    h = jax.nn.sigmoid(x * w1.reshape(1, 3) + b1.reshape(1, 3))          # (B, 3)
    pre = jnp.sum(h[:, :, None] * w2.reshape(1, 3, 4), axis=1) + b2.reshape(1, 4)
    return jax.nn.sigmoid(pre)                                            # (B, 4)


if __name__ == "__main__":
    key = jax.random.PRNGKey(0)
    k_x, k_w1, k_b1, k_w2, k_b2 = jax.random.split(key, 5)

    # Deterministic parameter init (shapes from Generator.__init__):
    #   Linear(1, 3): torch weight (3, 1) -> stored transposed as (1, 3)
    #   Linear(3, 4): torch weight (4, 3) -> stored transposed as (3, 4)
    w1 = jax.random.uniform(k_w1, (1, 3), jnp.float32, -1.0, 1.0)        # fan_in = 1
    b1 = jax.random.uniform(k_b1, (3,), jnp.float32, -1.0, 1.0)
    bound2 = 1.0 / jnp.sqrt(3.0)
    w2 = jax.random.uniform(k_w2, (3, 4), jnp.float32, -bound2, bound2)  # fan_in = 3
    b2 = jax.random.uniform(k_b2, (4,), jnp.float32, -bound2, bound2)

    # Case 1: tiny batch (matches the original GAN usage; single grid step).
    B = 8
    x = jax.random.uniform(k_x, (B, 1), jnp.float32)
    out = jax.block_until_ready(generator_forward(x, w1, b1, w2, b2))
    ref = _reference_forward(x, w1, b1, w2, b2)
    assert out.shape == (B, 4), out.shape
    assert jnp.allclose(out, ref, atol=1e-5, rtol=1e-5)

    # Case 2: ragged batch with a small tile -> multi-step parallel grid, partial
    # edge row-tile and a lane-tail pad.
    B2 = 3000
    x2 = jax.random.uniform(k_x, (B2, 1), jnp.float32)
    out2 = jax.block_until_ready(
        generator_forward(x2, w1, b1, w2, b2, max_tile_rows=16))
    ref2 = _reference_forward(x2, w1, b1, w2, b2)
    assert out2.shape == (B2, 4), out2.shape
    assert jnp.allclose(out2, ref2, atol=1e-5, rtol=1e-5)

    # Case 3: lane-aligned batch -> no pad copy, no tail slice, 2 parallel tiles.
    B3 = 4096
    x3 = jax.random.uniform(k_x, (B3, 1), jnp.float32)
    out3 = jax.block_until_ready(generator_forward(x3, w1, b1, w2, b2))
    ref3 = _reference_forward(x3, w1, b1, w2, b2)
    assert out3.shape == (B3, 4), out3.shape
    assert jnp.allclose(out3, ref3, atol=1e-5, rtol=1e-5)

    print("KERNEL_OK")
</pallas_src>

<mosaic_0001>
module attributes {stable_mosaic.version = 11 : i64} {
  func.func @_generator_kernel(%arg0: i32, %arg1: memref<8xf32, #tpu.memory_space<smem>>, %arg2: memref<1x512xf32, #tpu.memory_space<vmem>>, %arg3: memref<1152x512xbf16, #tpu.memory_space<vmem>>, %arg4: memref<8x128xf32, #tpu.memory_space<vmem>>, %arg5: memref<8x512xf32, #tpu.memory_space<vmem>>) attributes {dimension_semantics = [#tpu.dimension_semantics<parallel>], iteration_bounds = array<i64: 1>, scalar_prefetch = 0 : i64, scratch_operands = 0 : i64, tpu.core_type = #tpu.core_type<tc>, window_params = [{transform_indices = @transform_0, window_bounds = array<i64: 8>}, {pipeline_mode = #tpu.pipeline_mode<synchronous>, transform_indices = @transform_1, window_bounds = array<i64: 1, 512>}, {pipeline_mode = #tpu.pipeline_mode<synchronous>, transform_indices = @transform_2, window_bounds = array<i64: 1152, 512>}, {transform_indices = @transform_3, window_bounds = array<i64: 8, 128>}, {transform_indices = @transform_4, window_bounds = array<i64: 8, 512>}]} {
    %c0 = arith.constant 0 : index
    %0 = memref.load %arg1[%c0] : memref<8xf32, #tpu.memory_space<smem>>
    %c1 = arith.constant 1 : index
    %1 = memref.load %arg1[%c1] : memref<8xf32, #tpu.memory_space<smem>>
    %c2 = arith.constant 2 : index
    %2 = memref.load %arg1[%c2] : memref<8xf32, #tpu.memory_space<smem>>
    %c3 = arith.constant 3 : index
    %3 = memref.load %arg1[%c3] : memref<8xf32, #tpu.memory_space<smem>>
    %c4 = arith.constant 4 : index
    %4 = memref.load %arg1[%c4] : memref<8xf32, #tpu.memory_space<smem>>
    %c5 = arith.constant 5 : index
    %5 = memref.load %arg1[%c5] : memref<8xf32, #tpu.memory_space<smem>>
    %c0_0 = arith.constant 0 : index
    %c0_1 = arith.constant 0 : index
    %6 = vector.load %arg4[%c0_0, %c0_1] : memref<8x128xf32, #tpu.memory_space<vmem>>, vector<8x128xf32>
    %7 = vector.broadcast %0 : f32 to vector<8x128xf32>
    %8 = arith.mulf %6, %7 : vector<8x128xf32>
    %9 = vector.broadcast %3 : f32 to vector<8x128xf32>
    %10 = arith.addf %8, %9 : vector<8x128xf32>
    %11 = vector.broadcast %1 : f32 to vector<8x128xf32>
    %12 = arith.mulf %6, %11 : vector<8x128xf32>
    %13 = vector.broadcast %4 : f32 to vector<8x128xf32>
    %14 = arith.addf %12, %13 : vector<8x128xf32>
    %15 = vector.broadcast %2 : f32 to vector<8x128xf32>
    %16 = arith.mulf %6, %15 : vector<8x128xf32>
    %17 = vector.broadcast %5 : f32 to vector<8x128xf32>
    %18 = arith.addf %16, %17 : vector<8x128xf32>
    %19 = tpu.concatenate %10, %14, %18 in 1 : vector<8x128xf32>, vector<8x128xf32>, vector<8x128xf32> -> vector<8x384xf32>
    %20 = math.tanh %19 : vector<8x384xf32>
    %21 = arith.truncf %20 : vector<8x384xf32> to vector<8x384xbf16>
    %22 = arith.extf %21 : vector<8x384xbf16> to vector<8x384xf32>
    %23 = arith.subf %20, %22 : vector<8x384xf32>
    %24 = arith.truncf %23 : vector<8x384xf32> to vector<8x384xbf16>
    %25 = tpu.concatenate %21, %24, %21 in 1 : vector<8x384xbf16>, vector<8x384xbf16>, vector<8x384xbf16> -> vector<8x1152xbf16>
    %c0_2 = arith.constant 0 : index
    %c0_3 = arith.constant 0 : index
    %26 = vector.load %arg3[%c0_2, %c0_3] : memref<1152x512xbf16, #tpu.memory_space<vmem>>, vector<1152x512xbf16>
    %cst = arith.constant dense<0.000000e+00> : vector<8x512xf32>
    %27 = tpu.matmul %25, %26, %cst {dimension_numbers = #tpu.dot_dimension_numbers<[1], [0], [0], [1], [0, 0, 1, 1], [], []>} : vector<8x1152xbf16>, vector<1152x512xbf16>, vector<8x512xf32> -> vector<8x512xf32>
    %c0_4 = arith.constant 0 : index
    %c0_5 = arith.constant 0 : index
    %28 = vector.load %arg2[%c0_4, %c0_5] : memref<1x512xf32, #tpu.memory_space<vmem>>, vector<1x512xf32>
    %29 = vector.broadcast %28 : vector<1x512xf32> to vector<8x512xf32>
    %30 = arith.addf %27, %29 : vector<8x512xf32>
    %31 = math.tanh %30 : vector<8x512xf32>
    %cst_6 = arith.constant 5.000000e-01 : f32
    %32 = vector.broadcast %cst_6 : f32 to vector<8x512xf32>
    %33 = arith.mulf %32, %31 : vector<8x512xf32>
    %cst_7 = arith.constant 5.000000e-01 : f32
    %34 = vector.broadcast %cst_7 : f32 to vector<8x512xf32>
    %35 = arith.addf %33, %34 : vector<8x512xf32>
    %c0_8 = arith.constant 0 : index
    %c0_9 = arith.constant 0 : index
    %36 = vector.load %arg5[%c0_8, %c0_9] : memref<8x512xf32, #tpu.memory_space<vmem>>, vector<8x512xf32>
    tpu.vector_store %arg5[%c0_8, %c0_9], %35 {strides = array<i32>} : memref<8x512xf32, #tpu.memory_space<vmem>>, vector<8x512xf32>,
    return
  }
  func.func @transform_0(%arg0: i32) -> i32 {
    %c0_i32 = arith.constant 0 : i32
    %c0_i32_0 = arith.constant 0 : i32
    return %c0_i32 : i32
  }
  func.func @transform_1(%arg0: i32) -> (i32, i32) {
    %c0_i32 = arith.constant 0 : i32
    %c0_i32_0 = arith.constant 0 : i32
    %c0_i32_1 = arith.constant 0 : i32
    return %c0_i32, %c0_i32_0 : i32, i32
  }
  func.func @transform_2(%arg0: i32) -> (i32, i32) {
    %c0_i32 = arith.constant 0 : i32
    %c0_i32_0 = arith.constant 0 : i32
    %c0_i32_1 = arith.constant 0 : i32
    return %c0_i32, %c0_i32_0 : i32, i32
  }
  func.func @transform_3(%arg0: i32) -> (i32, i32) {
    %c0_i32 = arith.constant 0 : i32
    %c0_i32_0 = arith.constant 0 : i32
    return %arg0, %c0_i32 : i32, i32
  }
  func.func @transform_4(%arg0: i32) -> (i32, i32) {
    %c0_i32 = arith.constant 0 : i32
    %c0_i32_0 = arith.constant 0 : i32
    return %arg0, %c0_i32 : i32, i32
  }
}

</mosaic_0001>

<bundles_post_ra>
// kernel: tpu_custom_call.1
= control target key start
LH: loop header
LB: loop body
LE: loop exit
PB: predicated region body
PF: predicated region fallthrough
CT: control target
= control target key end

     0   :  { %9 = vsyncpa [#allocation5], 0  ;;  %s4085_s0 = inlined_call_operand.hbm [shape: f32[8], index: 0, kind: input, shape index: {}]   ;;  %s4086_s1 = inlined_call_operand.hbm [shape: f32[1,512], index: 1, kind: input, shape index: {}]   ;;  %s4087_s2 = inlined_call_operand.hbm [shape: bf16[1152,512], index: 2, kind: input, shape index: {}]   ;;  %s4088_s3 = inlined_call_operand.hbm [shape: f32[8,128], index: 3, kind: input, shape index: {}]   ;;  %s4089_s4 = inlined_call_operand.hbm [shape: f32[8,512], index: 4, kind: output, shape index: {}]  }
   0x1   :  { %10 = vsyncpa [#allocation3], 0 }
   0x2   :  { %11 = vsyncpa [#allocation8], 0  ;;  %s37_s17 = sshll.u32 %s4087_s2, 4  ;;  %s38_s17 = int_to_ptr.hbm [resolvable:$true] %s37_s17 }
   0x3   :  { %12 = vsyncpa [#allocation4], 0  ;;  %s3951_s18 = smov [#allocation7]   ;;  %s18_s22 = sshll.u32 %s4085_s0, 4  ;;  %s19_s22 = int_to_ptr.hbm [resolvable:$true] %s18_s22 }
   0x4   :  { %s39_s19 = sshll.u32 %s3951_s18, 4  ;;  %s3952_s23 = smov 256   ;;  %s40_s19 = int_to_ptr.vmem [resolvable:$true] %s39_s19 }
   0x5   :  { %s3953_s24 = smov 16   ;;  %s3954_s25 = smov [#allocation2]  }
   0x6   :  { %45 = dma.hbm_to_vmem [thread:$0]  %s38_s17, 36864, %s40_s19, [#allocation8], %s3952_s23, %s3952_s23, %s3953_s24  }
   0x7   :  { %21 = dma.hbm_to_smem %s19_s22, 16, %s3954_s25, [#allocation5]  }
   0x8   :  { %s27_s28 = sshll.u32 %s4086_s1, 4  ;;  %s3955_s2 = smov [#allocation6]   ;;  %s28_s28 = int_to_ptr.hbm [resolvable:$true] %s27_s28 }
   0x9   :  { %s29_s29 = sshll.u32 %s3955_s2, 4  ;;  %s51_s6 = sshll.u32 %s4088_s3, 4  ;;  %s30_s29 = int_to_ptr.vmem [resolvable:$true] %s29_s29  ;;  %s52_s6 = int_to_ptr.hbm [resolvable:$true] %s51_s6 }
   0xa   :  { %32 = dma.hbm_to_vmem [thread:$0]  %s28_s28, 64, %s30_s29, [#allocation3]  }
   0xb   :  { %s3956_s0 = smov [#allocation9]  }
   0xc   :  { %s53_s7 = sshll.u32 %s3956_s0, 4  ;;  %s54_s7 = int_to_ptr.vmem [resolvable:$true] %s53_s7 }
   0xd   :  { %56 = dma.hbm_to_vmem [thread:$0]  %s52_s6, 128, %s54_s7, [#allocation8]  }
   0xe   :  { %3943 = dma.done.wait [#allocation5], 16  }
   0xf   :  { %3944 = vsyncadd [#allocation5], 4294967280 }
  0x10   :  { %3945 = dma.done.wait [#allocation3], 64  }
  0x11   :  { %3946 = vsyncadd [#allocation3], 4294967232 }
  0x12   :  { %3947 = dma.done.wait [#allocation8], 36992  }
  0x13   :  { %3948 = vsyncadd [#allocation8], 4294930304 }
  0x14   :  { %73 = sfence }
  0x15   :  { %v2488_v0 = vld [vmem:[#allocation7 + $0xe0] sm:$0xf]  ;;  %v3556_v1 = vld [vmem:[#allocation7 + $0xec] sm:$0xf0]  ;;  %s3995_s1 = sld [smem:[#allocation2]]  ;;  %s3957_s12 = smov [#allocation10]  }
  0x16   :  { %v2616_v2 = vld [vmem:[#allocation7 + $0x1e0] sm:$0xf]  ;;  %v2489_v3 = vor.u32 %v3556_v1, %v2488_v0  ;;  %v3588_v4 = vld [vmem:[#allocation7 + $0x1ec] sm:$0xf0]  ;;  %s3997_s3 = sld [smem:[#allocation2 + $0x1]]  ;;  %s2355_s13 = sshll.u32 %s3957_s12, 4  ;;  %s2356_s13 = int_to_ptr.vmem [resolvable:$true] %s2355_s13 }
  0x17   :  { %v2744_v5 = vld [vmem:[#allocation7 + $0x2e0] sm:$0xf]  ;;  %v3620_v6 = vld [vmem:[#allocation7 + $0x2ec] sm:$0xf0]  ;;  %v2617_v7 = vor.u32 %v3588_v4, %v2616_v2  ;;  %s3999_s8 = sld [smem:[#allocation2 + $0x2]]  ;;  %s2357_s16 = sshll.u32 %s4089_s4, 4  ;;  %s2358_s16 = int_to_ptr.hbm [resolvable:$true] %s2357_s16 }
  0x18   :  { %v2745_v8 = vor.u32 %v3620_v6, %v2744_v5  ;;  %v2872_v9 = vld [vmem:[#allocation7 + $0x3e0] sm:$0xf]  ;;  %v3652_v10 = vld [vmem:[#allocation7 + $0x3ec] sm:$0xf0]  ;;  %1866 = vmatpush.bf16.msra.mxu0 %v2489_v3  ;;  %s4001_s9 = sld [smem:[#allocation2 + $0x5]] }
  0x19   :  { %v2472_v11 = vld [vmem:[#allocation7 + $0xc0] sm:$0xf]  ;;  %v2873_v12 = vor.u32 %v3652_v10, %v2872_v9  ;;  %v3552_v13 = vld [vmem:[#allocation7 + $0xcc] sm:$0xf0]  ;;  %1879 = vmatpush.bf16.msra.mxu1 %v2617_v7  ;;  %s4003_s10 = sld [smem:[#allocation2 + $0x3]] }
  0x1a   :  { %v2600_v14 = vld [vmem:[#allocation7 + $0x1c0] sm:$0xf]  ;;  %v3584_v15 = vld [vmem:[#allocation7 + $0x1cc] sm:$0xf0]  ;;  %1892 = vmatpush.bf16.msra.mxu2 %v2745_v8  ;;  %v2473_v16 = vor.u32 %v3552_v13, %v2472_v11  ;;  %s4005_s11 = sld [smem:[#allocation2 + $0x4]] }
  0x1b   :  { %v2601_v17 = vor.u32 %v3584_v15, %v2600_v14  ;;  %v2728_v18 = vld [vmem:[#allocation7 + $0x2c0] sm:$0xf]  ;;  %v3616_v19 = vld [vmem:[#allocation7 + $0x2cc] sm:$0xf0]  ;;  %1905 = vmatpush.bf16.msra.mxu3 %v2873_v12 }
  0x1c   :  { %v2856_v20 = vld [vmem:[#allocation7 + $0x3c0] sm:$0xf]  ;;  %v2729_v21 = vor.u32 %v3616_v19, %v2728_v18  ;;  %v3648_v22 = vld [vmem:[#allocation7 + $0x3cc] sm:$0xf0]  ;;  %1867 = vmatpush.bf16.msra.mxu0 %v2473_v16 }
  0x1d   :  { %v2456_v23 = vld [vmem:[#allocation7 + $0xa0] sm:$0xf]  ;;  %v3548_v24 = vld [vmem:[#allocation7 + $0xac] sm:$0xf0]  ;;  %v2857_v25 = vor.u32 %v3648_v22, %v2856_v20  ;;  %1880 = vmatpush.bf16.msra.mxu1 %v2601_v17 }
  0x1e   :  { %v2584_v26 = vld [vmem:[#allocation7 + $0x1a0] sm:$0xf]  ;;  %v3580_v27 = vld [vmem:[#allocation7 + $0x1ac] sm:$0xf0]  ;;  %v2457_v29 = vor.u32 %v3548_v24, %v2456_v23  ;;  %1893 = vmatpush.bf16.msra.mxu2 %v2729_v21 }
  0x1f   :  { %v2712_v28 = vld [vmem:[#allocation7 + $0x2a0] sm:$0xf]  ;;  %v3612_v30 = vld [vmem:[#allocation7 + $0x2ac] sm:$0xf0]  ;;  %v2585_v33 = vor.u32 %v3580_v27, %v2584_v26  ;;  %1906 = vmatpush.bf16.msra.mxu3 %v2857_v25 }
  0x20   :  { %v2840_v31 = vld [vmem:[#allocation7 + $0x3a0] sm:$0xf]  ;;  %v3644_v32 = vld [vmem:[#allocation7 + $0x3ac] sm:$0xf0]  ;;  %v2713_v34 = vor.u32 %v3612_v30, %v2712_v28  ;;  %1868 = vmatpush.bf16.msra.mxu0 %v2457_v29 }
  0x21   :  { %v2440_v35 = vld [vmem:[#allocation7 + $0x80] sm:$0xf]  ;;  %v3544_v36 = vld [vmem:[#allocation7 + $0x8c] sm:$0xf0]  ;;  %v2841_v38 = vor.u32 %v3644_v32, %v2840_v31  ;;  %1881 = vmatpush.bf16.msra.mxu1 %v2585_v33 }
  0x22   :  { %v2568_v37 = vld [vmem:[#allocation7 + $0x180] sm:$0xf]  ;;  %v3576_v39 = vld [vmem:[#allocation7 + $0x18c] sm:$0xf0]  ;;  %v2441_v44 = vor.u32 %v3544_v36, %v2440_v35  ;;  %1894 = vmatpush.bf16.msra.mxu2 %v2713_v34 }
  0x23   :  { %v2696_v40 = vld [vmem:[#allocation7 + $0x280] sm:$0xf]  ;;  %v3608_v41 = vld [vmem:[#allocation7 + $0x28c] sm:$0xf0]  ;;  %v2569_v45 = vor.u32 %v3576_v39, %v2568_v37  ;;  %1907 = vmatpush.bf16.msra.mxu3 %v2841_v38 }
  0x24   :  { %v2824_v42 = vld [vmem:[#allocation7 + $0x380] sm:$0xf]  ;;  %v3640_v43 = vld [vmem:[#allocation7 + $0x38c] sm:$0xf0]  ;;  %v2697_v46 = vor.u32 %v3608_v41, %v2696_v40  ;;  %1869 = vmatpush.bf16.msra.mxu0 %v2441_v44 }
  0x25   :  { %v2424_v47 = vld [vmem:[#allocation7 + $0x60] sm:$0xf]  ;;  %v3540_v48 = vld [vmem:[#allocation7 + $0x6c] sm:$0xf0]  ;;  %v2825_v50 = vor.u32 %v3640_v43, %v2824_v42  ;;  %1882 = vmatpush.bf16.msra.mxu1 %v2569_v45 }
  0x26   :  { %v2552_v49 = vld [vmem:[#allocation7 + $0x160] sm:$0xf]  ;;  %v3572_v51 = vld [vmem:[#allocation7 + $0x16c] sm:$0xf0]  ;;  %v2425_v56 = vor.u32 %v3540_v48, %v2424_v47  ;;  %1895 = vmatpush.bf16.msra.mxu2 %v2697_v46 }
  0x27   :  { %v2680_v52 = vld [vmem:[#allocation7 + $0x260] sm:$0xf]  ;;  %v3604_v53 = vld [vmem:[#allocation7 + $0x26c] sm:$0xf0]  ;;  %v2553_v57 = vor.u32 %v3572_v51, %v2552_v49  ;;  %1908 = vmatpush.bf16.msra.mxu3 %v2825_v50 }
  0x28   :  { %v2808_v54 = vld [vmem:[#allocation7 + $0x360] sm:$0xf]  ;;  %v3636_v55 = vld [vmem:[#allocation7 + $0x36c] sm:$0xf0]  ;;  %v2681_v58 = vor.u32 %v3604_v53, %v2680_v52  ;;  %1870 = vmatpush.bf16.msra.mxu0 %v2425_v56 }
  0x29   :  { %v2408_v59 = vld [vmem:[#allocation7 + $0x40] sm:$0xf]  ;;  %v3536_v60 = vld [vmem:[#allocation7 + $0x4c] sm:$0xf0]  ;;  %v2809_v62 = vor.u32 %v3636_v55, %v2808_v54  ;;  %1883 = vmatpush.bf16.msra.mxu1 %v2553_v57 }
  0x2a   :  { %v2536_v61 = vld [vmem:[#allocation7 + $0x140] sm:$0xf]  ;;  %v3568_v63 = vld [vmem:[#allocation7 + $0x14c] sm:$0xf0]  ;;  %v2409_v4 = vor.u32 %v3536_v60, %v2408_v59  ;;  %1896 = vmatpush.bf16.msra.mxu2 %v2681_v58 }
  0x2b   :  { %v2664_v0 = vld [vmem:[#allocation7 + $0x240] sm:$0xf]  ;;  %v3600_v1 = vld [vmem:[#allocation7 + $0x24c] sm:$0xf0]  ;;  %v2537_v5 = vor.u32 %v3568_v63, %v2536_v61  ;;  %1909 = vmatpush.bf16.msra.mxu3 %v2809_v62 }
  0x2c   :  { %v2792_v2 = vld [vmem:[#allocation7 + $0x340] sm:$0xf]  ;;  %v3632_v3 = vld [vmem:[#allocation7 + $0x34c] sm:$0xf0]  ;;  %v2665_v6 = vor.u32 %v3600_v1, %v2664_v0  ;;  %1871 = vmatpush.bf16.msra.mxu0 %v2409_v4 }
  0x2d   :  { %v2392_v7 = vld [vmem:[#allocation7 + $0x20] sm:$0xf]  ;;  %v3532_v8 = vld [vmem:[#allocation7 + $0x2c] sm:$0xf0]  ;;  %v2793_v10 = vor.u32 %v3632_v3, %v2792_v2  ;;  %1884 = vmatpush.bf16.msra.mxu1 %v2537_v5 }
  0x2e   :  { %v2520_v9 = vld [vmem:[#allocation7 + $0x120] sm:$0xf]  ;;  %v3564_v11 = vld [vmem:[#allocation7 + $0x12c] sm:$0xf0]  ;;  %v2393_v16 = vor.u32 %v3532_v8, %v2392_v7  ;;  %1897 = vmatpush.bf16.msra.mxu2 %v2665_v6 }
  0x2f   :  { %v2648_v12 = vld [vmem:[#allocation7 + $0x220] sm:$0xf]  ;;  %v3596_v13 = vld [vmem:[#allocation7 + $0x22c] sm:$0xf0]  ;;  %v2521_v19 = vor.u32 %v3564_v11, %v2520_v9  ;;  %1910 = vmatpush.bf16.msra.mxu3 %v2793_v10 }
  0x30   :  { %v2776_v14 = vld [vmem:[#allocation7 + $0x320] sm:$0xf]  ;;  %v3628_v15 = vld [vmem:[#allocation7 + $0x32c] sm:$0xf0]  ;;  %v2649_v20 = vor.u32 %v3596_v13, %v2648_v12  ;;  %1872 = vmatpush.bf16.msra.mxu0 %v2393_v16 }
  0x31   :  { %v2376_v17 = vld [vmem:[#allocation7] sm:$0xf]  ;;  %v3528_v18 = vld [vmem:[#allocation7 + $0xc] sm:$0xf0]  ;;  %v2777_v24 = vor.u32 %v3628_v15, %v2776_v14  ;;  %1885 = vmatpush.bf16.msra.mxu1 %v2521_v19 }
  0x32   :  { %v2504_v21 = vld [vmem:[#allocation7 + $0x100] sm:$0xf]  ;;  %v3560_v22 = vld [vmem:[#allocation7 + $0x10c] sm:$0xf0]  ;;  %v2377_v31 = vor.u32 %v3528_v18, %v2376_v17  ;;  %1898 = vmatpush.bf16.msra.mxu2 %v2649_v20 }
  0x33   :  { %v2632_v23 = vld [vmem:[#allocation7 + $0x200] sm:$0xf]  ;;  %v3592_v25 = vld [vmem:[#allocation7 + $0x20c] sm:$0xf0]  ;;  %v2505_v35 = vor.u32 %v3560_v22, %v2504_v21  ;;  %1911 = vmatpush.bf16.msra.mxu3 %v2777_v24 }
  0x34   :  { %v2760_v26 = vld [vmem:[#allocation7 + $0x300] sm:$0xf]  ;;  %v3624_v27 = vld [vmem:[#allocation7 + $0x30c] sm:$0xf0]  ;;  %v2633_v36 = vor.u32 %v3592_v25, %v2632_v23  ;;  %1873 = vmatpush.bf16.msra.mxu0 %v2377_v31  ;;  %v81_v23 = vstv %s3995_s1 }
  0x35   :  { %v3000_v28 = vld [vmem:[#allocation7 + $0x4e0] sm:$0xf]  ;;  %v3684_v29 = vld [vmem:[#allocation7 + $0x4ec] sm:$0xf0]  ;;  %v2761_v39 = vor.u32 %v3624_v27, %v2760_v26  ;;  %1886 = vmatpush.bf16.msra.mxu1 %v2505_v35  ;;  %v85_v27 = vstv %s3997_s3 }
  0x36   :  { %v3128_v30 = vld [vmem:[#allocation7 + $0x5e0] sm:$0xf]  ;;  %v3716_v32 = vld [vmem:[#allocation7 + $0x5ec] sm:$0xf0]  ;;  %v3001_v40 = vor.u32 %v3684_v29, %v3000_v28  ;;  %1899 = vmatpush.bf16.msra.mxu2 %v2633_v36 }
  0x37   :  { %v3256_v33 = vld [vmem:[#allocation7 + $0x6e0] sm:$0xf]  ;;  %v3748_v34 = vld [vmem:[#allocation7 + $0x6ec] sm:$0xf0]  ;;  %v3129_v41 = vor.u32 %v3716_v32, %v3128_v30  ;;  %1912 = vmatpush.bf16.msra.mxu3 %v2761_v39  ;;  %v89_v30 = vstv %s3999_s8 }
  0x38   :  { %v3384_v37 = vld [vmem:[#allocation7 + $0x7e0] sm:$0xf]  ;;  %v3780_v38 = vld [vmem:[#allocation7 + $0x7ec] sm:$0xf0]  ;;  %v3257_v42 = vor.u32 %v3748_v34, %v3256_v33  ;;  %1918 = vmatpush.bf16.msrb.mxu0 %v3001_v40 }
  0x39   :  { %v2984_v43 = vld [vmem:[#allocation7 + $0x4c0] sm:$0xf]  ;;  %v3680_v44 = vld [vmem:[#allocation7 + $0x4cc] sm:$0xf0]  ;;  %v3385_v46 = vor.u32 %v3780_v38, %v3384_v37  ;;  %1931 = vmatpush.bf16.msrb.mxu1 %v3129_v41  ;;  %v91_v37 = vstv %s4001_s9 }
  0x3a   :  { %v3112_v45 = vld [vmem:[#allocation7 + $0x5c0] sm:$0xf]  ;;  %v3712_v47 = vld [vmem:[#allocation7 + $0x5cc] sm:$0xf0]  ;;  %v2985_v52 = vor.u32 %v3680_v44, %v2984_v43  ;;  %1944 = vmatpush.bf16.msrb.mxu2 %v3257_v42  ;;  %v83_v42 = vstv %s4003_s10 }
  0x3b   :  { %v3240_v48 = vld [vmem:[#allocation7 + $0x6c0] sm:$0xf]  ;;  %v3744_v49 = vld [vmem:[#allocation7 + $0x6cc] sm:$0xf0]  ;;  %v3113_v53 = vor.u32 %v3712_v47, %v3112_v45  ;;  %1957 = vmatpush.bf16.msrb.mxu3 %v3385_v46  ;;  %v87_v47 = vstv %s4005_s11 }
  0x3c   :  { %v3368_v50 = vld [vmem:[#allocation7 + $0x7c0] sm:$0xf]  ;;  %v3776_v51 = vld [vmem:[#allocation7 + $0x7cc] sm:$0xf0]  ;;  %v3241_v54 = vor.u32 %v3744_v49, %v3240_v48  ;;  %1919 = vmatpush.bf16.msrb.mxu0 %v2985_v52 }
  0x3d   :  { %v2968_v55 = vld [vmem:[#allocation7 + $0x4a0] sm:$0xf]  ;;  %v3676_v56 = vld [vmem:[#allocation7 + $0x4ac] sm:$0xf0]  ;;  %v3369_v58 = vor.u32 %v3776_v51, %v3368_v50  ;;  %1932 = vmatpush.bf16.msrb.mxu1 %v3113_v53 }
  0x3e   :  { %v3096_v57 = vld [vmem:[#allocation7 + $0x5a0] sm:$0xf]  ;;  %v3708_v59 = vld [vmem:[#allocation7 + $0x5ac] sm:$0xf0]  ;;  %v2969_v0 = vor.u32 %v3676_v56, %v2968_v55  ;;  %1945 = vmatpush.bf16.msrb.mxu2 %v3241_v54 }
  0x3f   :  { %v3224_v60 = vld [vmem:[#allocation7 + $0x6a0] sm:$0xf]  ;;  %v3740_v61 = vld [vmem:[#allocation7 + $0x6ac] sm:$0xf0]  ;;  %v3097_v3 = vor.u32 %v3708_v59, %v3096_v57  ;;  %1958 = vmatpush.bf16.msrb.mxu3 %v3369_v58 }
  0x40   :  { %v3352_v62 = vld [vmem:[#allocation7 + $0x7a0] sm:$0xf]  ;;  %v3772_v63 = vld [vmem:[#allocation7 + $0x7ac] sm:$0xf0]  ;;  %v3225_v4 = vor.u32 %v3740_v61, %v3224_v60  ;;  %1920 = vmatpush.bf16.msrb.mxu0 %v2969_v0 }
  0x41   :  { %v2952_v1 = vld [vmem:[#allocation7 + $0x480] sm:$0xf]  ;;  %v3672_v2 = vld [vmem:[#allocation7 + $0x48c] sm:$0xf0]  ;;  %v3353_v7 = vor.u32 %v3772_v63, %v3352_v62  ;;  %1933 = vmatpush.bf16.msrb.mxu1 %v3097_v3 }
  0x42   :  { %v3080_v5 = vld [vmem:[#allocation7 + $0x580] sm:$0xf]  ;;  %v3704_v6 = vld [vmem:[#allocation7 + $0x58c] sm:$0xf0]  ;;  %v2953_v12 = vor.u32 %v3672_v2, %v2952_v1  ;;  %1946 = vmatpush.bf16.msrb.mxu2 %v3225_v4 }
  0x43   :  { %v3208_v8 = vld [vmem:[#allocation7 + $0x680] sm:$0xf]  ;;  %v3736_v9 = vld [vmem:[#allocation7 + $0x68c] sm:$0xf0]  ;;  %v3081_v15 = vor.u32 %v3704_v6, %v3080_v5  ;;  %1959 = vmatpush.bf16.msrb.mxu3 %v3353_v7 }
  0x44   :  { %v3336_v10 = vld [vmem:[#allocation7 + $0x780] sm:$0xf]  ;;  %v3768_v11 = vld [vmem:[#allocation7 + $0x78c] sm:$0xf0]  ;;  %v3209_v16 = vor.u32 %v3736_v9, %v3208_v8  ;;  %1921 = vmatpush.bf16.msrb.mxu0 %v2953_v12 }
  0x45   :  { %v2936_v13 = vld [vmem:[#allocation7 + $0x460] sm:$0xf]  ;;  %v3668_v17 = vld [vmem:[#allocation7 + $0x46c] sm:$0xf0]  ;;  %v3337_v19 = vor.u32 %v3768_v11, %v3336_v10  ;;  %1934 = vmatpush.bf16.msrb.mxu1 %v3081_v15 }
  0x46   :  { %v80_v14 = vld [vmem:[#allocation9] sm:$0xff]  ;;  %v3700_v20 = vld [vmem:[#allocation7 + $0x56c] sm:$0xf0]  ;;  %v2937_v28 = vor.u32 %v3668_v17, %v2936_v13  ;;  %1947 = vmatpush.bf16.msrb.mxu2 %v3209_v16 }
  0x47   :  { %v3064_v18 = vld [vmem:[#allocation7 + $0x560] sm:$0xf]  ;;  %v3732_v22 = vld [vmem:[#allocation7 + $0x66c] sm:$0xf0]  ;;  %v82_v26 = vmul.f32 %v81_v23, %v80_v14  ;;  %v86_v29 = vmul.f32 %v85_v27, %v80_v14  ;;  %v90_v36 = vmul.f32 %v89_v30, %v80_v14  ;;  %1960 = vmatpush.bf16.msrb.mxu3 %v3337_v19  ;;  %v3586_v13 = vld [vmem:[#allocation7 + $0x1e4] sm:$0xf] }
  0x48   :  { %v3192_v21 = vld [vmem:[#allocation7 + $0x660] sm:$0xf]  ;;  %v3764_v25 = vld [vmem:[#allocation7 + $0x76c] sm:$0xf0]  ;;  %v3065_v31 = vor.u32 %v3700_v20, %v3064_v18  ;;  %1922 = vmatpush.bf16.msrb.mxu0 %v2937_v28  ;;  %v2618_v14 = vld [vmem:[#allocation7 + $0x1f0] sm:$0xf0] }
  0x49   :  { %v3320_v24 = vld [vmem:[#allocation7 + $0x760] sm:$0xf]  ;;  %v3193_v32 = vor.u32 %v3732_v22, %v3192_v21  ;;  %v3664_v34 = vld [vmem:[#allocation7 + $0x44c] sm:$0xf0]  ;;  %v92_v45 = vadd.f32 %v91_v37, %v90_v36  ;;  %v84_v46 = vadd.f32 %v83_v42, %v82_v26  ;;  %v88_v49 = vadd.f32 %v87_v47, %v86_v29  ;;  %v3554_v23 = vld [vmem:[#allocation7 + $0xe4] sm:$0xf] }
  0x4a   :  { %v2920_v33 = vld [vmem:[#allocation7 + $0x440] sm:$0xf]  ;;  %v3321_v38 = vor.u32 %v3764_v25, %v3320_v24  ;;  %v3696_v39 = vld [vmem:[#allocation7 + $0x54c] sm:$0xf0]  ;;  %1935 = vmatpush.bf16.msrb.mxu1 %v3065_v31  ;;  %v2490_v24 = vld [vmem:[#allocation7 + $0xf0] sm:$0xf0]  ;;  %v2621_v25 = vor.u32 %v3586_v13, %v2618_v14 }
  0x4b   :  { %v3048_v35 = vld [vmem:[#allocation7 + $0x540] sm:$0xf]  ;;  %v3728_v41 = vld [vmem:[#allocation7 + $0x64c] sm:$0xf0]  ;;  %v2921_v48 = vor.u32 %v3664_v34, %v2920_v33  ;;  %1948 = vmatpush.bf16.msrb.mxu2 %v3193_v32  ;;  %3821 = vtanh.f32 %v92_v45  ;;  %v3582_v30 = vld [vmem:[#allocation7 + $0x1c4] sm:$0xf]  ;;  %v2493_v34 = vor.u32 %v3554_v23, %v2490_v24 }
  0x4c   :  { %v3176_v40 = vld [vmem:[#allocation7 + $0x640] sm:$0xf]  ;;  %v3760_v44 = vld [vmem:[#allocation7 + $0x74c] sm:$0xf0]  ;;  %v3049_v50 = vor.u32 %v3696_v39, %v3048_v35  ;;  %1961 = vmatpush.bf16.msrb.mxu3 %v3321_v38  ;;  %3823 = vtanh.f32 %v84_v46  ;;  %v2602_v31 = vld [vmem:[#allocation7 + $0x1d0] sm:$0xf0] }
  0x4d   :  { %v3304_v43 = vld [vmem:[#allocation7 + $0x740] sm:$0xf]  ;;  %v3177_v51 = vor.u32 %v3728_v41, %v3176_v40  ;;  %v3660_v53 = vld [vmem:[#allocation7 + $0x42c] sm:$0xf0]  ;;  %3825 = vtanh.f32 %v88_v49  ;;  %1923 = vmatpush.bf16.msrb.mxu0 %v2921_v48  ;;  %v3618_v42 = vld [vmem:[#allocation7 + $0x2e4] sm:$0xf]  ;;  %v2605_v45 = vor.u32 %v3582_v30, %v2602_v31 }
  0x4e   :  { %v2904_v52 = vld [vmem:[#allocation7 + $0x420] sm:$0xf]  ;;  %v3305_v55 = vor.u32 %v3760_v44, %v3304_v43  ;;  %v3692_v56 = vld [vmem:[#allocation7 + $0x52c] sm:$0xf0]  ;;  %1936 = vmatpush.bf16.msrb.mxu1 %v3049_v50  ;;  %v3550_v43 = vld [vmem:[#allocation7 + $0xc4] sm:$0xf] }
  0x4f   :  { %v3032_v54 = vld [vmem:[#allocation7 + $0x520] sm:$0xf]  ;;  %v3724_v58 = vld [vmem:[#allocation7 + $0x62c] sm:$0xf0]  ;;  %v2905_v61 = vor.u32 %v3660_v53, %v2904_v52  ;;  %1949 = vmatpush.bf16.msrb.mxu2 %v3177_v51  ;;  %v2474_v44 = vld [vmem:[#allocation7 + $0xd0] sm:$0xf0] }
  0x50   :  { %v3160_v57 = vld [vmem:[#allocation7 + $0x620] sm:$0xf]  ;;  %v3756_v60 = vld [vmem:[#allocation7 + $0x72c] sm:$0xf0]  ;;  %v3033_v62 = vor.u32 %v3692_v56, %v3032_v54  ;;  %1962 = vmatpush.bf16.msrb.mxu3 %v3305_v55  ;;  %v2746_v47 = vld [vmem:[#allocation7 + $0x2f0] sm:$0xf0]  ;;  %v2477_v53 = vor.u32 %v3550_v43, %v2474_v44 }
  0x51   :  { %v3288_v59 = vld [vmem:[#allocation7 + $0x720] sm:$0xf]  ;;  %v3161_v63 = vor.u32 %v3724_v58, %v3160_v57  ;;  %v3656_v1 = vld [vmem:[#allocation7 + $0x40c] sm:$0xf0]  ;;  %v3822_v7 = vpop.eup %3821  ;;  %1924 = vmatpush.bf16.msrb.mxu0 %v2905_v61  ;;  %v3578_v48 = vld [vmem:[#allocation7 + $0x1a4] sm:$0xf]  ;;  %v2749_v56 = vor.u32 %v3618_v42, %v2746_v47 }
  0x52   :  { %v2888_v0 = vld [vmem:[#allocation7 + $0x400] sm:$0xf]  ;;  %v3289_v3 = vor.u32 %v3756_v60, %v3288_v59  ;;  %v3688_v4 = vld [vmem:[#allocation7 + $0x50c] sm:$0xf0]  ;;  %v3824_v10 = vpop.eup %3823  ;;  %v97_v11 = vpack.c.bf16 %v3822_v7, %v3822_v7  ;;  %1937 = vmatpush.bf16.msrb.mxu1 %v3033_v62  ;;  %v2586_v49 = vld [vmem:[#allocation7 + $0x1b0] sm:$0xf0] }
  0x53   :  { %v3016_v2 = vld [vmem:[#allocation7 + $0x500] sm:$0xf]  ;;  %v3720_v6 = vld [vmem:[#allocation7 + $0x60c] sm:$0xf0]  ;;  %v2889_v12 = vor.u32 %v3656_v1, %v2888_v0  ;;  %v3826_v15 = vpop.eup %3825  ;;  %1950 = vmatpush.bf16.msrb.mxu2 %v3161_v63  ;;  %v3614_v57 = vld [vmem:[#allocation7 + $0x2c4] sm:$0xf]  ;;  %v2589_v60 = vor.u32 %v3578_v48, %v2586_v49 }
  0x54   :  { %v3144_v5 = vld [vmem:[#allocation7 + $0x600] sm:$0xf]  ;;  %v3752_v9 = vld [vmem:[#allocation7 + $0x70c] sm:$0xf0]  ;;  %v3017_v16 = vor.u32 %v3688_v4, %v3016_v2  ;;  %v110_v19 = vunpack.c.l.b16 %v97_v11  ;;  %v96_v20 = vpack.c.bf16 %v3826_v15, %v3824_v10  ;;  %1963 = vmatpush.bf16.msrb.mxu3 %v3289_v3  ;;  %v100_v35 = vunpack.c.l.bf16 %v97_v11  ;;  %v3546_v58 = vld [vmem:[#allocation7 + $0xa4] sm:$0xf] }
  0x55   :  { %v3272_v8 = vld [vmem:[#allocation7 + $0x700] sm:$0xf]  ;;  %v3145_v17 = vor.u32 %v3720_v6, %v3144_v5  ;;  %v3812_v22 = vld [vmem:[#allocation7 + $0x8ec] sm:$0xf0]  ;;  %1925 = vmatpush.bf16.msrb.mxu0 %v2889_v12  ;;  %v2458_v59 = vld [vmem:[#allocation7 + $0xb0] sm:$0xf0] }
  0x56   :  { %v3512_v18 = vld [vmem:[#allocation7 + $0x8e0] sm:$0xf]  ;;  %v3273_v21 = vor.u32 %v3752_v9, %v3272_v8  ;;  %v4013_v26 = vpack.c.b16 %v110_v19, %v110_v19  ;;  %v108_v27 = vunpack.c.l.b16 %v96_v20  ;;  %v98_v28 = vunpack.c.l.bf16 %v96_v20  ;;  %1938 = vmatpush.bf16.msrb.mxu1 %v3017_v16  ;;  %v3808_v40 = vld [vmem:[#allocation7 + $0x8cc] sm:$0xf0]  ;;  %v2730_v62 = vld [vmem:[#allocation7 + $0x2d0] sm:$0xf0] }
  0x57   :  { %v99_v29 = vunpack.c.h.bf16 %v96_v20  ;;  %v109_v32 = vunpack.c.h.b16 %v96_v20  ;;  %1951 = vmatpush.bf16.msrb.mxu2 %v3145_v17  ;;  %v3513_v33 = vor.u32 %v3812_v22, %v3512_v18  ;;  %v3496_v39 = vld [vmem:[#allocation7 + $0x8c0] sm:$0xf]  ;;  %v103_v51 = vsub.f32 %v3822_v7, %v100_v35  ;;  %v3804_v55 = vld [vmem:[#allocation7 + $0x8ac] sm:$0xf0]  ;;  %v3574_v63 = vld [vmem:[#allocation7 + $0x184] sm:$0xf] }
  0x58   :  { %1900 = vmatmul.bf16.vlgmr.msra.gmra.mxu2 %v4013_v26  ;;  %v4016_v36 = vpack.c.b16 %v108_v27, %v108_v27  ;;  %v101_v37 = vsub.f32 %v3824_v10, %v98_v28  ;;  %1964 = vmatpush.bf16.msrb.mxu3 %v3273_v21  ;;  %v3497_v50 = vor.u32 %v3808_v40, %v3496_v39  ;;  %v3480_v54 = vld [vmem:[#allocation7 + $0x8a0] sm:$0xf]  ;;  %v2570_v0 = vld [vmem:[#allocation7 + $0x190] sm:$0xf0]  ;;  %v3800_v5 = vld [vmem:[#allocation7 + $0x88c] sm:$0xf0] }
  0x59   :  { %v102_v38 = vsub.f32 %v3826_v15, %v99_v29  ;;  %v4018_v41 = vpack.c.b16 %v109_v32, %v109_v32  ;;  %v3481_v1 = vor.u32 %v3804_v55, %v3480_v54  ;;  %v105_v2 = vpack.c.bf16 %v103_v51, %v103_v51  ;;  %v3464_v4 = vld [vmem:[#allocation7 + $0x880] sm:$0xf]  ;;  %v3610_v7 = vld [vmem:[#allocation7 + $0x2a4] sm:$0xf]  ;;  %v2442_v9 = vld [vmem:[#allocation7 + $0x90] sm:$0xf0] }
  0x5a   :  { %1874 = vmatmul.bf16.vlgmr.msra.gmra.mxu0 %v4016_v36  ;;  %v2461_v3 = vor.u32 %v3546_v58, %v2458_v59  ;;  %v2733_v6 = vor.u32 %v3614_v57, %v2730_v62  ;;  %v3542_v8 = vld [vmem:[#allocation7 + $0x84] sm:$0xf]  ;;  %v2573_v10 = vor.u32 %v3574_v63, %v2570_v0  ;;  %v2714_v11 = vld [vmem:[#allocation7 + $0x2b0] sm:$0xf0]  ;;  %v3465_v16 = vor.u32 %v3800_v5, %v3464_v4  ;;  %v3448_v18 = vld [vmem:[#allocation7 + $0x860] sm:$0xf] }
  0x5b   :  { %1996 = vmatpush.bf16.msra.mxu2 %v2621_v25  ;;  %v104_v46 = vpack.c.bf16 %v102_v38, %v101_v37  ;;  %1887 = vmatmul.bf16.vlgmr.msra.gmra.mxu1 %v4018_v41  ;;  %v3570_v13 = vld [vmem:[#allocation7 + $0x164] sm:$0xf]  ;;  %v2554_v14 = vld [vmem:[#allocation7 + $0x170] sm:$0xf0]  ;;  %v121_v15 = vunpack.c.l.b16 %v105_v2  ;;  %v2445_v17 = vor.u32 %v3542_v8, %v2442_v9  ;;  %v3796_v19 = vld [vmem:[#allocation7 + $0x86c] sm:$0xf0]  ;;  %v2717_v20 = vor.u32 %v3610_v7, %v2714_v11 }
  0x5c   :  { %1970 = vmatpush.bf16.msra.mxu0 %v3513_v33  ;;  %1983 = vmatpush.bf16.msra.mxu1 %v2493_v34  ;;  %v3606_v21 = vld [vmem:[#allocation7 + $0x284] sm:$0xf]  ;;  %v2426_v23 = vld [vmem:[#allocation7 + $0x70] sm:$0xf0]  ;;  %v2557_v24 = vor.u32 %v3570_v13, %v2554_v14  ;;  %v3449_v31 = vor.u32 %v3796_v19, %v3448_v18  ;;  %v3432_v33 = vld [vmem:[#allocation7 + $0x840] sm:$0xf] }
  0x5d   :  { %v119_v52 = vunpack.c.l.b16 %v104_v46  ;;  %v120_v12 = vunpack.c.h.b16 %v104_v46  ;;  %v3538_v22 = vld [vmem:[#allocation7 + $0x64] sm:$0xf]  ;;  %v2698_v27 = vld [vmem:[#allocation7 + $0x290] sm:$0xf0]  ;;  %v4027_v30 = vpack.c.b16 %v121_v15, %v121_v15  ;;  %v3792_v34 = vld [vmem:[#allocation7 + $0x84c] sm:$0xf0] }
  0x5e   :  { %v3566_v28 = vld [vmem:[#allocation7 + $0x144] sm:$0xf]  ;;  %v2538_v29 = vld [vmem:[#allocation7 + $0x150] sm:$0xf0]  ;;  %v2429_v32 = vor.u32 %v3538_v22, %v2426_v23  ;;  %v2701_v35 = vor.u32 %v3606_v21, %v2698_v27  ;;  %v3416_v47 = vld [vmem:[#allocation7 + $0x820] sm:$0xf] }
  0x5f   :  { %1997 = vmatpush.bf16.msra.mxu2 %v2605_v45  ;;  %v4022_v61 = vpack.c.b16 %v119_v52, %v119_v52  ;;  %v4025_v25 = vpack.c.b16 %v120_v12, %v120_v12  ;;  %v3602_v37 = vld [vmem:[#allocation7 + $0x264] sm:$0xf]  ;;  %v2410_v39 = vld [vmem:[#allocation7 + $0x50] sm:$0xf0]  ;;  %v2541_v40 = vor.u32 %v3566_v28, %v2538_v29  ;;  %v3433_v45 = vor.u32 %v3792_v34, %v3432_v33  ;;  %v3788_v48 = vld [vmem:[#allocation7 + $0x82c] sm:$0xf0] }
  0x60   :  { %1971 = vmatpush.bf16.msra.mxu0 %v3497_v50  ;;  %1984 = vmatpush.bf16.msra.mxu1 %v2477_v53  ;;  %v3534_v38 = vld [vmem:[#allocation7 + $0x44] sm:$0xf]  ;;  %v2682_v42 = vld [vmem:[#allocation7 + $0x270] sm:$0xf0]  ;;  %v3417_v57 = vor.u32 %v3788_v48, %v3416_v47  ;;  %v3400_v63 = vld [vmem:[#allocation7 + $0x800] sm:$0xf] }
  0x61   :  { %1913 = vmatmul.bf16.vlgmr.msra.gmra.mxu3 %v4022_v61  ;;  %v3562_v43 = vld [vmem:[#allocation7 + $0x124] sm:$0xf]  ;;  %v2522_v44 = vld [vmem:[#allocation7 + $0x130] sm:$0xf0]  ;;  %v2413_v46 = vor.u32 %v3534_v38, %v2410_v39  ;;  %v2685_v49 = vor.u32 %v3602_v37, %v2682_v42  ;;  %v3784_v0 = vld [vmem:[#allocation7 + $0x80c] sm:$0xf0] }
  0x62   :  { %2009 = vmatpush.bf16.msra.mxu3 %v2749_v56  ;;  %v3598_v50 = vld [vmem:[#allocation7 + $0x244] sm:$0xf]  ;;  %v2394_v52 = vld [vmem:[#allocation7 + $0x30] sm:$0xf0]  ;;  %v2525_v53 = vor.u32 %v3562_v43, %v2522_v44  ;;  %v3401_v11 = vor.u32 %v3784_v0, %v3400_v63 }
  0x63   :  { %1998 = vmatpush.bf16.msra.mxu2 %v2589_v60  ;;  %v3530_v51 = vld [vmem:[#allocation7 + $0x24] sm:$0xf]  ;;  %v2666_v54 = vld [vmem:[#allocation7 + $0x250] sm:$0xf0] }
  0x64   :  { %1972 = vmatpush.bf16.msra.mxu0 %v3481_v1  ;;  %1985 = vmatpush.bf16.msra.mxu1 %v2461_v3  ;;  %v3558_v55 = vld [vmem:[#allocation7 + $0x104] sm:$0xf]  ;;  %v2506_v56 = vld [vmem:[#allocation7 + $0x110] sm:$0xf0]  ;;  %v2397_v60 = vor.u32 %v3530_v51, %v2394_v52  ;;  %v2669_v2 = vor.u32 %v3598_v50, %v2666_v54 }
  0x65   :  { %v3714_v58 = vld [vmem:[#allocation7 + $0x5e4] sm:$0xf]  ;;  %v3130_v59 = vld [vmem:[#allocation7 + $0x5f0] sm:$0xf0]  ;;  %v2509_v4 = vor.u32 %v3558_v55, %v2506_v56 }
  0x66   :  { %2010 = vmatpush.bf16.msra.mxu3 %v2733_v6  ;;  %v3594_v62 = vld [vmem:[#allocation7 + $0x224] sm:$0xf]  ;;  %v2378_v3 = vld [vmem:[#allocation7 + $0x10] sm:$0xf0] }
  0x67   :  { %1999 = vmatpush.bf16.msra.mxu2 %v2573_v10  ;;  %v3526_v1 = vld [vmem:[#allocation7 + $0x4] sm:$0xf]  ;;  %v2874_v6 = vld [vmem:[#allocation7 + $0x3f0] sm:$0xf0]  ;;  %v3133_v10 = vor.u32 %v3714_v58, %v3130_v59 }
  0x68   :  { %1973 = vmatpush.bf16.msra.mxu0 %v3465_v16  ;;  %1952 = vmatmul.bf16.vlgmr.msrb.gmra.mxu2 %v4016_v36  ;;  %v3650_v5 = vld [vmem:[#allocation7 + $0x3e4] sm:$0xf]  ;;  %v2650_v7 = vld [vmem:[#allocation7 + $0x230] sm:$0xf0]  ;;  %v2381_v14 = vor.u32 %v3526_v1, %v2378_v3 }
  0x69   :  { %1986 = vmatpush.bf16.msra.mxu1 %v2445_v17  ;;  %v3682_v8 = vld [vmem:[#allocation7 + $0x4e4] sm:$0xf]  ;;  %v3002_v9 = vld [vmem:[#allocation7 + $0x4f0] sm:$0xf0]  ;;  %v2877_v16 = vor.u32 %v3650_v5, %v2874_v6  ;;  %v2653_v17 = vor.u32 %v3594_v62, %v2650_v7 }
  0x6a   :  { %2011 = vmatpush.bf16.msra.mxu3 %v2717_v20  ;;  %1926 = vmatmul.bf16.vlgmr.msrb.gmra.mxu0 %v4025_v25  ;;  %v3710_v12 = vld [vmem:[#allocation7 + $0x5c4] sm:$0xf]  ;;  %v3114_v13 = vld [vmem:[#allocation7 + $0x5d0] sm:$0xf0]  ;;  %v3005_v19 = vor.u32 %v3682_v8, %v3002_v9 }
  0x6b   :  { %2000 = vmatpush.bf16.msra.mxu2 %v2557_v24  ;;  %1939 = vmatmul.bf16.vlgmr.msrb.gmra.mxu1 %v4027_v30  ;;  %v3590_v15 = vld [vmem:[#allocation7 + $0x204] sm:$0xf]  ;;  %v2634_v18 = vld [vmem:[#allocation7 + $0x210] sm:$0xf0]  ;;  %v3117_v27 = vor.u32 %v3710_v12, %v3114_v13 }
  0x6c   :  { %1974 = vmatpush.bf16.msra.mxu0 %v3449_v31  ;;  %v3646_v20 = vld [vmem:[#allocation7 + $0x3c4] sm:$0xf]  ;;  %v2858_v21 = vld [vmem:[#allocation7 + $0x3d0] sm:$0xf0]  ;;  %v2637_v33 = vor.u32 %v3590_v15, %v2634_v18 }
  0x6d   :  { %1987 = vmatpush.bf16.msra.mxu1 %v2429_v32  ;;  %v3746_v22 = vld [vmem:[#allocation7 + $0x6e4] sm:$0xf]  ;;  %v2986_v24 = vld [vmem:[#allocation7 + $0x4d0] sm:$0xf0]  ;;  %v2861_v32 = vor.u32 %v3646_v20, %v2858_v21 }
  0x6e   :  { %2012 = vmatpush.bf16.msra.mxu3 %v2701_v35  ;;  %v3678_v23 = vld [vmem:[#allocation7 + $0x4c4] sm:$0xf]  ;;  %v3258_v28 = vld [vmem:[#allocation7 + $0x6f0] sm:$0xf0] }
  0x6f   :  { %2001 = vmatpush.bf16.msra.mxu2 %v2541_v40  ;;  %v3706_v29 = vld [vmem:[#allocation7 + $0x5a4] sm:$0xf]  ;;  %v3098_v31 = vld [vmem:[#allocation7 + $0x5b0] sm:$0xf0]  ;;  %v2989_v34 = vor.u32 %v3678_v23, %v2986_v24  ;;  %v3261_v38 = vor.u32 %v3746_v22, %v3258_v28 }
  0x70   :  { %1975 = vmatpush.bf16.msra.mxu0 %v3433_v45  ;;  %v3642_v35 = vld [vmem:[#allocation7 + $0x3a4] sm:$0xf]  ;;  %v2842_v37 = vld [vmem:[#allocation7 + $0x3b0] sm:$0xf0]  ;;  %v3101_v43 = vor.u32 %v3706_v29, %v3098_v31 }
  0x71   :  { %1965 = vmatmul.bf16.vlgmr.msrb.gmra.mxu3 %v4018_v41  ;;  %1988 = vmatpush.bf16.msra.mxu1 %v2413_v46  ;;  %v3742_v39 = vld [vmem:[#allocation7 + $0x6c4] sm:$0xf]  ;;  %v2970_v42 = vld [vmem:[#allocation7 + $0x4b0] sm:$0xf0]  ;;  %v2845_v47 = vor.u32 %v3642_v35, %v2842_v37  ;;  %v2496_v37 = vld [vmem:[#allocation7 + $0xe8] sm:$0xf] }
  0x72   :  { %2013 = vmatpush.bf16.msra.mxu3 %v2685_v49  ;;  %v3674_v40 = vld [vmem:[#allocation7 + $0x4a4] sm:$0xf]  ;;  %v3242_v44 = vld [vmem:[#allocation7 + $0x6d0] sm:$0xf0] }
  0x73   :  { %2002 = vmatpush.bf16.msra.mxu2 %v2525_v53  ;;  %v3702_v45 = vld [vmem:[#allocation7 + $0x584] sm:$0xf]  ;;  %v3082_v46 = vld [vmem:[#allocation7 + $0x590] sm:$0xf0]  ;;  %v2973_v48 = vor.u32 %v3674_v40, %v2970_v42  ;;  %v3245_v51 = vor.u32 %v3742_v39, %v3242_v44 }
  0x74   :  { %1976 = vmatpush.bf16.msra.mxu0 %v3417_v57  ;;  %v3638_v49 = vld [vmem:[#allocation7 + $0x384] sm:$0xf]  ;;  %v2826_v50 = vld [vmem:[#allocation7 + $0x390] sm:$0xf0]  ;;  %v3085_v55 = vor.u32 %v3702_v45, %v3082_v46 }
  0x75   :  { %1989 = vmatpush.bf16.msra.mxu1 %v2397_v60  ;;  %v3738_v52 = vld [vmem:[#allocation7 + $0x6a4] sm:$0xf]  ;;  %v2954_v54 = vld [vmem:[#allocation7 + $0x490] sm:$0xf0]  ;;  %v2829_v59 = vor.u32 %v3638_v49, %v2826_v50 }
  0x76   :  { %2014 = vmatpush.bf16.msra.mxu3 %v2669_v2  ;;  %v3670_v53 = vld [vmem:[#allocation7 + $0x484] sm:$0xf]  ;;  %v3226_v56 = vld [vmem:[#allocation7 + $0x6b0] sm:$0xf0] }
  0x77   :  { %2003 = vmatpush.bf16.msra.mxu2 %v2509_v4  ;;  %v3698_v57 = vld [vmem:[#allocation7 + $0x564] sm:$0xf]  ;;  %v3066_v58 = vld [vmem:[#allocation7 + $0x570] sm:$0xf0]  ;;  %v2957_v60 = vor.u32 %v3670_v53, %v2954_v54  ;;  %v3229_v0 = vor.u32 %v3738_v52, %v3226_v56  ;;  %v3553_v56 = vld [vmem:[#allocation7 + $0xd4] sm:$0xf0] }
  0x78   :  { %1977 = vmatpush.bf16.msra.mxu0 %v3401_v11  ;;  %v3634_v62 = vld [vmem:[#allocation7 + $0x364] sm:$0xf]  ;;  %v2810_v63 = vld [vmem:[#allocation7 + $0x370] sm:$0xf0]  ;;  %v3069_v4 = vor.u32 %v3698_v57, %v3066_v58 }
  0x79   :  { %1990 = vmatpush.bf16.msra.mxu1 %v2381_v14  ;;  %v3734_v1 = vld [vmem:[#allocation7 + $0x684] sm:$0xf]  ;;  %v2938_v3 = vld [vmem:[#allocation7 + $0x470] sm:$0xf0]  ;;  %v2813_v8 = vor.u32 %v3634_v62, %v2810_v63 }
  0x7a   :  { %2015 = vmatpush.bf16.msra.mxu3 %v2653_v17  ;;  %2004 = vmatmul.bf16.vlgmr.msra.gmra.mxu2 %v4018_v41  ;;  %v3666_v2 = vld [vmem:[#allocation7 + $0x464] sm:$0xf]  ;;  %v3210_v5 = vld [vmem:[#allocation7 + $0x690] sm:$0xf0] }
  0x7b   :  { %2048 = vmatpush.bf16.msrb.mxu2 %v3133_v10  ;;  %1978 = vmatmul.bf16.vlgmr.msra.gmra.mxu0 %v4013_v26  ;;  %v3694_v6 = vld [vmem:[#allocation7 + $0x544] sm:$0xf]  ;;  %v3050_v7 = vld [vmem:[#allocation7 + $0x550] sm:$0xf0]  ;;  %v2941_v9 = vor.u32 %v3666_v2, %v2938_v3  ;;  %v3213_v12 = vor.u32 %v3734_v1, %v3210_v5  ;;  %v2624_v2 = vld [vmem:[#allocation7 + $0x1e8] sm:$0xf] }
  0x7c   :  { %2022 = vmatpush.bf16.msrb.mxu0 %v2877_v16  ;;  %1991 = vmatmul.bf16.vlgmr.msra.gmra.mxu1 %v4016_v36  ;;  %v3630_v10 = vld [vmem:[#allocation7 + $0x344] sm:$0xf]  ;;  %v2794_v11 = vld [vmem:[#allocation7 + $0x350] sm:$0xf0]  ;;  %v3053_v16 = vor.u32 %v3694_v6, %v3050_v7  ;;  %v3589_v6 = vld [vmem:[#allocation7 + $0x1f4] sm:$0xf0] }
  0x7d   :  { %2035 = vmatpush.bf16.msrb.mxu1 %v3005_v19  ;;  %v3730_v13 = vld [vmem:[#allocation7 + $0x664] sm:$0xf]  ;;  %v2922_v15 = vld [vmem:[#allocation7 + $0x450] sm:$0xf0]  ;;  %v2797_v20 = vor.u32 %v3630_v10, %v2794_v11  ;;  %v2464_v7 = vld [vmem:[#allocation7 + $0xa8] sm:$0xf] }
  0x7e   :  { %2016 = vmatpush.bf16.msra.mxu3 %v2637_v33  ;;  %v3662_v14 = vld [vmem:[#allocation7 + $0x444] sm:$0xf]  ;;  %v3194_v17 = vld [vmem:[#allocation7 + $0x670] sm:$0xf0] }
  0x7f   :  { %2049 = vmatpush.bf16.msrb.mxu2 %v3117_v27  ;;  %v3690_v18 = vld [vmem:[#allocation7 + $0x524] sm:$0xf]  ;;  %v3034_v19 = vld [vmem:[#allocation7 + $0x530] sm:$0xf0]  ;;  %v2925_v21 = vor.u32 %v3662_v14, %v2922_v15  ;;  %v3197_v24 = vor.u32 %v3730_v13, %v3194_v17  ;;  %v2625_v14 = vor.u32 %v3589_v6, %v2624_v2  ;;  %v2608_v15 = vld [vmem:[#allocation7 + $0x1c8] sm:$0xf] }
  0x80   :  { %2023 = vmatpush.bf16.msrb.mxu0 %v2861_v32  ;;  %v3626_v22 = vld [vmem:[#allocation7 + $0x324] sm:$0xf]  ;;  %v2778_v23 = vld [vmem:[#allocation7 + $0x330] sm:$0xf0]  ;;  %v3037_v31 = vor.u32 %v3690_v18, %v3034_v19  ;;  %v3585_v19 = vld [vmem:[#allocation7 + $0x1d4] sm:$0xf0] }
  0x81   :  { %2036 = vmatpush.bf16.msrb.mxu1 %v2989_v34  ;;  %2017 = vmatmul.bf16.vlgmr.msra.gmra.mxu3 %v4013_v26  ;;  %v3726_v27 = vld [vmem:[#allocation7 + $0x644] sm:$0xf]  ;;  %v2906_v29 = vld [vmem:[#allocation7 + $0x430] sm:$0xf0]  ;;  %v2781_v35 = vor.u32 %v3626_v22, %v2778_v23 }
  0x82   :  { %2061 = vmatpush.bf16.msrb.mxu3 %v3261_v38  ;;  %v3658_v28 = vld [vmem:[#allocation7 + $0x424] sm:$0xf]  ;;  %v3178_v32 = vld [vmem:[#allocation7 + $0x650] sm:$0xf0]  ;;  %v3557_v38 = vld [vmem:[#allocation7 + $0xf4] sm:$0xf0] }
  0x83   :  { %2050 = vmatpush.bf16.msrb.mxu2 %v3101_v43  ;;  %v3686_v33 = vld [vmem:[#allocation7 + $0x504] sm:$0xf]  ;;  %v3018_v34 = vld [vmem:[#allocation7 + $0x510] sm:$0xf0]  ;;  %v2909_v39 = vor.u32 %v3658_v28, %v2906_v29  ;;  %v3181_v45 = vor.u32 %v3726_v27, %v3178_v32  ;;  %v2497_v53 = vor.u32 %v3557_v38, %v2496_v37  ;;  %v2609_v28 = vor.u32 %v3585_v19, %v2608_v15  ;;  %v2592_v29 = vld [vmem:[#allocation7 + $0x1a8] sm:$0xf] }
  0x84   :  { %2024 = vmatpush.bf16.msrb.mxu0 %v2845_v47  ;;  %v3722_v40 = vld [vmem:[#allocation7 + $0x624] sm:$0xf]  ;;  %v2762_v43 = vld [vmem:[#allocation7 + $0x310] sm:$0xf0]  ;;  %v3021_v47 = vor.u32 %v3686_v33, %v3018_v34  ;;  %v3581_v34 = vld [vmem:[#allocation7 + $0x1b4] sm:$0xf0] }
  0x85   :  { %2037 = vmatpush.bf16.msrb.mxu1 %v2973_v48  ;;  %v3622_v42 = vld [vmem:[#allocation7 + $0x304] sm:$0xf]  ;;  %v2890_v46 = vld [vmem:[#allocation7 + $0x410] sm:$0xf0]  ;;  %v3541_v37 = vld [vmem:[#allocation7 + $0x74] sm:$0xf0] }
  0x86   :  { %2062 = vmatpush.bf16.msrb.mxu3 %v3245_v51  ;;  %v3654_v44 = vld [vmem:[#allocation7 + $0x404] sm:$0xf]  ;;  %v3386_v49 = vld [vmem:[#allocation7 + $0x7f0] sm:$0xf0]  ;;  %v2765_v54 = vor.u32 %v3622_v42, %v2762_v43  ;;  %v2593_v43 = vor.u32 %v3581_v34, %v2592_v29  ;;  %v3653_v29 = vld [vmem:[#allocation7 + $0x3f4] sm:$0xf0] }
  0x87   :  { %2051 = vmatpush.bf16.msrb.mxu2 %v3085_v55  ;;  %v3778_v48 = vld [vmem:[#allocation7 + $0x7e4] sm:$0xf]  ;;  %v3162_v50 = vld [vmem:[#allocation7 + $0x630] sm:$0xf0]  ;;  %v2480_v55 = vld [vmem:[#allocation7 + $0xc8] sm:$0xf]  ;;  %v2893_v57 = vor.u32 %v3654_v44, %v2890_v46 }
  0x88   :  { %2025 = vmatpush.bf16.msrb.mxu0 %v2829_v59  ;;  %v3810_v51 = vld [vmem:[#allocation7 + $0x8e4] sm:$0xf]  ;;  %v3514_v52 = vld [vmem:[#allocation7 + $0x8f0] sm:$0xf0]  ;;  %v3389_v59 = vor.u32 %v3778_v48, %v3386_v49  ;;  %v2481_v5 = vor.u32 %v3553_v56, %v2480_v55  ;;  %v2576_v44 = vld [vmem:[#allocation7 + $0x188] sm:$0xf] }
  0x89   :  { %2038 = vmatpush.bf16.msrb.mxu1 %v2957_v60  ;;  %v3718_v58 = vld [vmem:[#allocation7 + $0x604] sm:$0xf]  ;;  %v3165_v60 = vor.u32 %v3722_v40, %v3162_v50  ;;  %v3146_v62 = vld [vmem:[#allocation7 + $0x610] sm:$0xf0]  ;;  %v3517_v63 = vor.u32 %v3810_v51, %v3514_v52  ;;  %v3577_v48 = vld [vmem:[#allocation7 + $0x194] sm:$0xf0] }
  0x8a   :  { %2063 = vmatpush.bf16.msrb.mxu3 %v3229_v0  ;;  %v3774_v0 = vld [vmem:[#allocation7 + $0x7c4] sm:$0xf]  ;;  %v3370_v1 = vld [vmem:[#allocation7 + $0x7d0] sm:$0xf0]  ;;  %v3149_v10 = vor.u32 %v3718_v58, %v3146_v62  ;;  %v2416_v49 = vld [vmem:[#allocation7 + $0x48] sm:$0xf]  ;;  %v2577_v55 = vor.u32 %v3577_v48, %v2576_v44 }
  0x8b   :  { %2052 = vmatpush.bf16.msrb.mxu2 %v3069_v4  ;;  %v3806_v3 = vld [vmem:[#allocation7 + $0x8c4] sm:$0xf]  ;;  %v3498_v4 = vld [vmem:[#allocation7 + $0x8d0] sm:$0xf0]  ;;  %v3537_v50 = vld [vmem:[#allocation7 + $0x54] sm:$0xf0] }
  0x8c   :  { %2026 = vmatpush.bf16.msrb.mxu0 %v2813_v8  ;;  %v3549_v8 = vld [vmem:[#allocation7 + $0xb4] sm:$0xf0]  ;;  %v3501_v11 = vor.u32 %v3806_v3, %v3498_v4  ;;  %v3354_v13 = vld [vmem:[#allocation7 + $0x7b0] sm:$0xf0]  ;;  %v3762_v40 = vld [vmem:[#allocation7 + $0x764] sm:$0xf] }
  0x8d   :  { %2039 = vmatpush.bf16.msrb.mxu1 %v2941_v9  ;;  %v3373_v9 = vor.u32 %v3774_v0, %v3370_v1  ;;  %v3482_v17 = vld [vmem:[#allocation7 + $0x8b0] sm:$0xf0]  ;;  %v2465_v18 = vor.u32 %v3549_v8, %v2464_v7  ;;  %v2560_v56 = vld [vmem:[#allocation7 + $0x168] sm:$0xf]  ;;  %v3754_v2 = vld [vmem:[#allocation7 + $0x724] sm:$0xf] }
  0x8e   :  { %2064 = vmatpush.bf16.msrb.mxu3 %v3213_v12  ;;  %v3770_v12 = vld [vmem:[#allocation7 + $0x7a4] sm:$0xf]  ;;  %v3338_v27 = vld [vmem:[#allocation7 + $0x790] sm:$0xf0]  ;;  %v2400_v62 = vld [vmem:[#allocation7 + $0x28] sm:$0xf] }
  0x8f   :  { %2053 = vmatpush.bf16.msrb.mxu2 %v3053_v16  ;;  %v3802_v16 = vld [vmem:[#allocation7 + $0x8a4] sm:$0xf]  ;;  %v3357_v22 = vor.u32 %v3770_v12, %v3354_v13  ;;  %v3466_v32 = vld [vmem:[#allocation7 + $0x890] sm:$0xf0]  ;;  %v3008_v13 = vld [vmem:[#allocation7 + $0x4e8] sm:$0xf] }
  0x90   :  { %2027 = vmatpush.bf16.msrb.mxu0 %v2797_v20  ;;  %v2448_v20 = vld [vmem:[#allocation7 + $0x88] sm:$0xf]  ;;  %v3485_v23 = vor.u32 %v3802_v16, %v3482_v17  ;;  %v3322_v42 = vld [vmem:[#allocation7 + $0x770] sm:$0xf0]  ;;  %v3786_v6 = vld [vmem:[#allocation7 + $0x824] sm:$0xf] }
  0x91   :  { %2040 = vmatpush.bf16.msrb.mxu1 %v2925_v21  ;;  %v3545_v21 = vld [vmem:[#allocation7 + $0x94] sm:$0xf0]  ;;  %v3450_v46 = vld [vmem:[#allocation7 + $0x870] sm:$0xf0]  ;;  %v3325_v51 = vor.u32 %v3762_v40, %v3322_v42  ;;  %v2528_v16 = vld [vmem:[#allocation7 + $0x128] sm:$0xf] }
  0x92   :  { %2065 = vmatpush.bf16.msrb.mxu3 %v3197_v24  ;;  %v3766_v24 = vld [vmem:[#allocation7 + $0x784] sm:$0xf]  ;;  %v2449_v33 = vor.u32 %v3545_v21, %v2448_v20  ;;  %v3434_v58 = vld [vmem:[#allocation7 + $0x850] sm:$0xf0]  ;;  %v3681_v34 = vld [vmem:[#allocation7 + $0x4d4] sm:$0xf0] }
  0x93   :  { %2054 = vmatpush.bf16.msrb.mxu2 %v3037_v31  ;;  %v3798_v31 = vld [vmem:[#allocation7 + $0x884] sm:$0xf]  ;;  %v3341_v38 = vor.u32 %v3766_v24, %v3338_v27  ;;  %v3290_v3 = vld [vmem:[#allocation7 + $0x730] sm:$0xf0]  ;;  %v3621_v24 = vld [vmem:[#allocation7 + $0x2f4] sm:$0xf0] }
  0x94   :  { %2028 = vmatpush.bf16.msrb.mxu0 %v2781_v35  ;;  %v2432_v35 = vld [vmem:[#allocation7 + $0x68] sm:$0xf]  ;;  %v3418_v7 = vld [vmem:[#allocation7 + $0x830] sm:$0xf0]  ;;  %v3293_v12 = vor.u32 %v3754_v2, %v3290_v3  ;;  %v3750_v17 = vld [vmem:[#allocation7 + $0x704] sm:$0xf] }
  0x95   :  { %2041 = vmatpush.bf16.msrb.mxu1 %v2909_v39  ;;  %v3469_v39 = vor.u32 %v3798_v31, %v3466_v32  ;;  %v3421_v15 = vor.u32 %v3786_v6, %v3418_v7  ;;  %v3782_v19 = vld [vmem:[#allocation7 + $0x804] sm:$0xf]  ;;  %v3402_v21 = vld [vmem:[#allocation7 + $0x810] sm:$0xf0]  ;;  %v3565_v27 = vld [vmem:[#allocation7 + $0x134] sm:$0xf0] }
  0x96   :  { %2066 = vmatpush.bf16.msrb.mxu3 %v3181_v45  ;;  %v3794_v45 = vld [vmem:[#allocation7 + $0x864] sm:$0xf]  ;;  %v3561_v40 = vld [vmem:[#allocation7 + $0x114] sm:$0xf0]  ;;  %v3104_v7 = vld [vmem:[#allocation7 + $0x5a8] sm:$0xf] }
  0x97   :  { %2055 = vmatpush.bf16.msrb.mxu2 %v3021_v47  ;;  %v2433_v47 = vor.u32 %v3541_v37, %v2432_v35  ;;  %v3453_v52 = vor.u32 %v3794_v45, %v3450_v46  ;;  %v3405_v35 = vor.u32 %v3782_v19, %v3402_v21  ;;  %v2512_v37 = vld [vmem:[#allocation7 + $0x108] sm:$0xf]  ;;  %v3617_v44 = vld [vmem:[#allocation7 + $0x2d4] sm:$0xf0] }
  0x98   :  { %2029 = vmatpush.bf16.msrb.mxu0 %v2765_v54  ;;  %v3306_v54 = vld [vmem:[#allocation7 + $0x750] sm:$0xf0]  ;;  %v3136_v45 = vld [vmem:[#allocation7 + $0x5e8] sm:$0xf]  ;;  %v3637_v21 = vld [vmem:[#allocation7 + $0x374] sm:$0xf0] }
  0x99   :  { %2042 = vmatpush.bf16.msrb.mxu1 %v2893_v57  ;;  %v3790_v57 = vld [vmem:[#allocation7 + $0x844] sm:$0xf]  ;;  %v2864_v46 = vld [vmem:[#allocation7 + $0x3c8] sm:$0xf] }
  0x9a   :  { %2067 = vmatpush.bf16.msrb.mxu3 %v3165_v60  ;;  %2056 = vmatmul.bf16.vlgmr.msrb.gmra.mxu2 %v4027_v30  ;;  %v3573_v60 = vld [vmem:[#allocation7 + $0x174] sm:$0xf0]  ;;  %v3437_v1 = vor.u32 %v3790_v57, %v3434_v58  ;;  %v3120_v58 = vld [vmem:[#allocation7 + $0x5c8] sm:$0xf] }
  0x9b   :  { %2100 = vmatpush.bf16.msra.mxu2 %v2497_v53  ;;  %2030 = vmatmul.bf16.vlgmr.msrb.gmra.mxu0 %v4022_v61  ;;  %v3758_v53 = vld [vmem:[#allocation7 + $0x744] sm:$0xf]  ;;  %v2561_v4 = vor.u32 %v3573_v60, %v2560_v56  ;;  %v3613_v56 = vld [vmem:[#allocation7 + $0x2b4] sm:$0xf0]  ;;  %v3088_v19 = vld [vmem:[#allocation7 + $0x588] sm:$0xf] }
  0x9c   :  { %2074 = vmatpush.bf16.msra.mxu0 %v3389_v59  ;;  %2043 = vmatmul.bf16.vlgmr.msrb.gmra.mxu1 %v4025_v25  ;;  %v2417_v59 = vor.u32 %v3537_v50, %v2416_v49  ;;  %v3309_v0 = vor.u32 %v3758_v53, %v3306_v54  ;;  %v3717_v49 = vld [vmem:[#allocation7 + $0x5f4] sm:$0xf0]  ;;  %v2976_v50 = vld [vmem:[#allocation7 + $0x4a8] sm:$0xf]  ;;  %v2513_v53 = vor.u32 %v3561_v40, %v2512_v37 }
  0x9d   :  { %2087 = vmatpush.bf16.msra.mxu1 %v3517_v63  ;;  %v3533_v63 = vld [vmem:[#allocation7 + $0x34] sm:$0xf0]  ;;  %v3137_v57 = vor.u32 %v3717_v49, %v3136_v45  ;;  %v2912_v40 = vld [vmem:[#allocation7 + $0x428] sm:$0xf] }
  0x9e   :  { %2068 = vmatpush.bf16.msrb.mxu3 %v3149_v10  ;;  %v2401_v8 = vor.u32 %v3533_v63, %v2400_v62  ;;  %v2384_v10 = vld [vmem:[#allocation7 + $0x8] sm:$0xf]  ;;  %v3645_v60 = vld [vmem:[#allocation7 + $0x3b4] sm:$0xf0] }
  0x9f   :  { %2101 = vmatpush.bf16.msra.mxu2 %v2481_v5  ;;  %v2544_v5 = vld [vmem:[#allocation7 + $0x148] sm:$0xf]  ;;  %v3713_v63 = vld [vmem:[#allocation7 + $0x5d4] sm:$0xf0] }
  0xa0   :  { %2075 = vmatpush.bf16.msra.mxu0 %v3373_v9  ;;  %v3569_v9 = vld [vmem:[#allocation7 + $0x154] sm:$0xf0]  ;;  %v3121_v6 = vor.u32 %v3713_v63, %v3120_v58  ;;  %v2656_v45 = vld [vmem:[#allocation7 + $0x228] sm:$0xf] }
  0xa1   :  { %2088 = vmatpush.bf16.msra.mxu1 %v3501_v11  ;;  %2069 = vmatmul.bf16.vlgmr.msrb.gmra.mxu3 %v4016_v36  ;;  %v3529_v11 = vld [vmem:[#allocation7 + $0x14] sm:$0xf0]  ;;  %v2545_v20 = vor.u32 %v3569_v9, %v2544_v5  ;;  %v2784_v49 = vld [vmem:[#allocation7 + $0x328] sm:$0xf] }
  0xa2   :  { %2113 = vmatpush.bf16.msra.mxu3 %v2625_v14  ;;  %v3685_v14 = vld [vmem:[#allocation7 + $0x4f4] sm:$0xf0]  ;;  %v2768_v63 = vld [vmem:[#allocation7 + $0x308] sm:$0xf] }
  0xa3   :  { %2102 = vmatpush.bf16.msra.mxu2 %v2465_v18  ;;  %v3274_v18 = vld [vmem:[#allocation7 + $0x710] sm:$0xf0]  ;;  %v3009_v31 = vor.u32 %v3685_v14, %v3008_v13  ;;  %v3609_v5 = vld [vmem:[#allocation7 + $0x294] sm:$0xf0] }
  0xa4   :  { %2076 = vmatpush.bf16.msra.mxu0 %v3357_v22  ;;  %v2385_v22 = vor.u32 %v3529_v11, %v2384_v10  ;;  %v3277_v32 = vor.u32 %v3750_v17, %v3274_v18  ;;  %v3641_v9 = vld [vmem:[#allocation7 + $0x394] sm:$0xf0] }
  0xa5   :  { %2089 = vmatpush.bf16.msra.mxu1 %v3485_v23  ;;  %v2752_v23 = vld [vmem:[#allocation7 + $0x2e8] sm:$0xf]  ;;  %v3709_v11 = vld [vmem:[#allocation7 + $0x5b4] sm:$0xf0] }
  0xa6   :  { %2114 = vmatpush.bf16.msra.mxu3 %v2609_v28  ;;  %v2880_v28 = vld [vmem:[#allocation7 + $0x3e8] sm:$0xf]  ;;  %v3669_v13 = vld [vmem:[#allocation7 + $0x474] sm:$0xf0]  ;;  %v3105_v18 = vor.u32 %v3709_v11, %v3104_v7 }
  0xa7   :  { %2103 = vmatpush.bf16.msra.mxu2 %v2449_v33  ;;  %v2992_v33 = vld [vmem:[#allocation7 + $0x4c8] sm:$0xf]  ;;  %v2881_v42 = vor.u32 %v3653_v29, %v2880_v28  ;;  %v3605_v17 = vld [vmem:[#allocation7 + $0x274] sm:$0xf0] }
  0xa8   :  { %2077 = vmatpush.bf16.msra.mxu0 %v3341_v38  ;;  %v2753_v38 = vor.u32 %v3621_v24, %v2752_v23  ;;  %v2993_v48 = vor.u32 %v3681_v34, %v2992_v33  ;;  %v3705_v23 = vld [vmem:[#allocation7 + $0x594] sm:$0xf0]  ;;  %v2928_v24 = vld [vmem:[#allocation7 + $0x448] sm:$0xf] }
  0xa9   :  { %2090 = vmatpush.bf16.msra.mxu1 %v3469_v39  ;;  %v2529_v39 = vor.u32 %v3565_v27, %v2528_v16  ;;  %v2688_v16 = vld [vmem:[#allocation7 + $0x268] sm:$0xf]  ;;  %v3665_v27 = vld [vmem:[#allocation7 + $0x454] sm:$0xf0]  ;;  %v3089_v33 = vor.u32 %v3705_v23, %v3088_v19 }
  0xaa   :  { %2115 = vmatpush.bf16.msra.mxu3 %v2593_v43  ;;  %v2736_v43 = vld [vmem:[#allocation7 + $0x2c8] sm:$0xf]  ;;  %v2689_v28 = vor.u32 %v3605_v17, %v2688_v16  ;;  %v3633_v37 = vld [vmem:[#allocation7 + $0x354] sm:$0xf0] }
  0xab   :  { %2104 = vmatpush.bf16.msra.mxu2 %v2433_v47  ;;  %v3649_v47 = vld [vmem:[#allocation7 + $0x3d4] sm:$0xf0]  ;;  %v3072_v34 = vld [vmem:[#allocation7 + $0x568] sm:$0xf] }
  0xac   :  { %2078 = vmatpush.bf16.msra.mxu0 %v3325_v51  ;;  %v3677_v51 = vld [vmem:[#allocation7 + $0x4b4] sm:$0xf0]  ;;  %v2865_v54 = vor.u32 %v3649_v47, %v2864_v46 }
  0xad   :  { %2091 = vmatpush.bf16.msra.mxu1 %v3453_v52  ;;  %v2737_v52 = vor.u32 %v3617_v44, %v2736_v43  ;;  %v2977_v62 = vor.u32 %v3677_v51, %v2976_v50  ;;  %v3597_v46 = vld [vmem:[#allocation7 + $0x234] sm:$0xf0] }
  0xae   :  { %2116 = vmatpush.bf16.msra.mxu3 %v2577_v55  ;;  %v2720_v55 = vld [vmem:[#allocation7 + $0x2a8] sm:$0xf]  ;;  %v3629_v50 = vld [vmem:[#allocation7 + $0x334] sm:$0xf0] }
  0xaf   :  { %2105 = vmatpush.bf16.msra.mxu2 %v2417_v59  ;;  %v2848_v59 = vld [vmem:[#allocation7 + $0x3a8] sm:$0xf]  ;;  %v2721_v2 = vor.u32 %v3613_v56, %v2720_v55  ;;  %v2657_v55 = vor.u32 %v3597_v46, %v2656_v45  ;;  %v2785_v58 = vor.u32 %v3629_v50, %v2784_v49  ;;  %v3781_v7 = vld [vmem:[#allocation7 + $0x7f4] sm:$0xf0] }
  0xb0   :  { %2079 = vmatpush.bf16.msra.mxu0 %v3309_v0  ;;  %v2960_v0 = vld [vmem:[#allocation7 + $0x488] sm:$0xf]  ;;  %v2849_v3 = vor.u32 %v3645_v60, %v2848_v59  ;;  %v3809_v11 = vld [vmem:[#allocation7 + $0x8d4] sm:$0xf0] }
  0xb1   :  { %2092 = vmatpush.bf16.msra.mxu1 %v3437_v1  ;;  %v3673_v1 = vld [vmem:[#allocation7 + $0x494] sm:$0xf0]  ;;  %v3520_v56 = vld [vmem:[#allocation7 + $0x8e8] sm:$0xf] }
  0xb2   :  { %2117 = vmatpush.bf16.msra.mxu3 %v2561_v4  ;;  %v2704_v4 = vld [vmem:[#allocation7 + $0x288] sm:$0xf]  ;;  %v2961_v10 = vor.u32 %v3673_v1, %v2960_v0  ;;  %v3625_v1 = vld [vmem:[#allocation7 + $0x314] sm:$0xf0] }
  0xb3   :  { %2106 = vmatpush.bf16.msra.mxu2 %v2401_v8  ;;  %v2832_v8 = vld [vmem:[#allocation7 + $0x388] sm:$0xf]  ;;  %v2705_v14 = vor.u32 %v3609_v5, %v2704_v4  ;;  %v3749_v4 = vld [vmem:[#allocation7 + $0x6f4] sm:$0xf0] }
  0xb4   :  { %2080 = vmatpush.bf16.msra.mxu0 %v3293_v12  ;;  %v2944_v12 = vld [vmem:[#allocation7 + $0x468] sm:$0xf]  ;;  %v3693_v5 = vld [vmem:[#allocation7 + $0x534] sm:$0xf0] }
  0xb5   :  { %2093 = vmatpush.bf16.msra.mxu1 %v3421_v15  ;;  %v2833_v15 = vor.u32 %v3641_v9, %v2832_v8  ;;  %v3040_v59 = vld [vmem:[#allocation7 + $0x528] sm:$0xf]  ;;  %v3689_v16 = vld [vmem:[#allocation7 + $0x514] sm:$0xf0] }
  0xb6   :  { %2118 = vmatpush.bf16.msra.mxu3 %v2545_v20  ;;  %v2816_v20 = vld [vmem:[#allocation7 + $0x368] sm:$0xf]  ;;  %v3745_v19 = vld [vmem:[#allocation7 + $0x6d4] sm:$0xf0] }
  0xb7   :  { %2107 = vmatpush.bf16.msra.mxu2 %v2385_v22  ;;  %v2945_v22 = vor.u32 %v3669_v13, %v2944_v12  ;;  %v2817_v29 = vor.u32 %v3637_v21, %v2816_v20  ;;  %v2640_v60 = vld [vmem:[#allocation7 + $0x208] sm:$0xf]  ;;  %v2769_v12 = vor.u32 %v3625_v1, %v2768_v63  ;;  %v3555_v20 = vld [vmem:[#allocation7 + $0xec] sm:$0xf]  ;;  %v3801_v45 = vld [vmem:[#allocation7 + $0x894] sm:$0xf0] }
  0xb8   :  { %2081 = vmatpush.bf16.msra.mxu0 %v3277_v32  ;;  %v3601_v32 = vld [vmem:[#allocation7 + $0x254] sm:$0xf0]  ;;  %v3024_v13 = vld [vmem:[#allocation7 + $0x508] sm:$0xf] }
  0xb9   :  { %2094 = vmatpush.bf16.msra.mxu1 %v3405_v35  ;;  %v2800_v35 = vld [vmem:[#allocation7 + $0x348] sm:$0xf]  ;;  %v3737_v50 = vld [vmem:[#allocation7 + $0x694] sm:$0xf0] }
  0xba   :  { %2119 = vmatpush.bf16.msra.mxu3 %v2529_v39  ;;  %2108 = vmatmul.bf16.vlgmr.msra.gmra.mxu2 %v4016_v36  ;;  %v3701_v39 = vld [vmem:[#allocation7 + $0x574] sm:$0xf0]  ;;  %v2801_v44 = vor.u32 %v3633_v37, %v2800_v35  ;;  %v3376_v21 = vld [vmem:[#allocation7 + $0x7c8] sm:$0xf] }
  0xbb   :  { %2152 = vmatpush.bf16.msrb.mxu2 %v3009_v31  ;;  %2082 = vmatmul.bf16.vlgmr.msra.gmra.mxu0 %v4018_v41  ;;  %v2672_v31 = vld [vmem:[#allocation7 + $0x248] sm:$0xf]  ;;  %v3073_v47 = vor.u32 %v3701_v39, %v3072_v34  ;;  %v3741_v35 = vld [vmem:[#allocation7 + $0x6b4] sm:$0xf0] }
  0xbc   :  { %2126 = vmatpush.bf16.msrb.mxu0 %v2753_v38  ;;  %2095 = vmatmul.bf16.vlgmr.msra.gmra.mxu1 %v4013_v26  ;;  %v2929_v38 = vor.u32 %v3665_v27, %v2928_v24  ;;  %v2673_v43 = vor.u32 %v3601_v32, %v2672_v31  ;;  %v2498_v24 = vld [vmem:[#allocation7 + $0xf8] sm:$0xf0]  ;;  %v3488_v27 = vld [vmem:[#allocation7 + $0x8a8] sm:$0xf]  ;;  %v3025_v31 = vor.u32 %v3689_v16, %v3024_v13  ;;  %v3733_v1 = vld [vmem:[#allocation7 + $0x674] sm:$0xf0] }
  0xbd   :  { %2139 = vmatpush.bf16.msrb.mxu1 %v2881_v42  ;;  %v3661_v42 = vld [vmem:[#allocation7 + $0x434] sm:$0xf0]  ;;  %v4045_v32 = vld [vmem:[#allocation6] sm:$0xf]  ;;  %v3232_v34 = vld [vmem:[#allocation7 + $0x6a8] sm:$0xf]  ;;  %v2501_v37 = vor.u32 %v3555_v20, %v2498_v24 }
  0xbe   :  { %2120 = vmatpush.bf16.msra.mxu3 %v2513_v53  ;;  %v2913_v51 = vor.u32 %v3661_v42, %v2912_v40  ;;  %v2896_v53 = vld [vmem:[#allocation7 + $0x408] sm:$0xf]  ;;  %v3773_v40 = vld [vmem:[#allocation7 + $0x7b4] sm:$0xf0]  ;;  %v3233_v46 = vor.u32 %v3741_v35, %v3232_v34 }
  0xbf   :  { %2153 = vmatpush.bf16.msrb.mxu2 %v2993_v48  ;;  %v3056_v48 = vld [vmem:[#allocation7 + $0x548] sm:$0xf]  ;;  %v3789_v24 = vld [vmem:[#allocation7 + $0x834] sm:$0xf0] }
  0xc0   :  { %2127 = vmatpush.bf16.msrb.mxu0 %v2737_v52  ;;  %v3697_v52 = vld [vmem:[#allocation7 + $0x554] sm:$0xf0]  ;;  %v3360_v39 = vld [vmem:[#allocation7 + $0x7a8] sm:$0xf] }
  0xc1   :  { %2140 = vmatpush.bf16.msrb.mxu1 %v2865_v54  ;;  %2121 = vmatmul.bf16.vlgmr.msra.gmra.mxu3 %v4018_v41  ;;  %v3657_v54 = vld [vmem:[#allocation7 + $0x414] sm:$0xf0]  ;;  %v3057_v0 = vor.u32 %v3697_v52, %v3056_v48  ;;  %v3361_v48 = vor.u32 %v3773_v40, %v3360_v39  ;;  %v3216_v49 = vld [vmem:[#allocation7 + $0x688] sm:$0xf]  ;;  %v3547_v52 = vld [vmem:[#allocation7 + $0xac] sm:$0xf] }
  0xc2   :  { %2165 = vmatpush.bf16.msrb.mxu3 %v3137_v57  ;;  %v3813_v57 = vld [vmem:[#allocation7 + $0x8f4] sm:$0xf0] }
  0xc3   :  { %2154 = vmatpush.bf16.msrb.mxu2 %v2977_v62  ;;  %v3593_v62 = vld [vmem:[#allocation7 + $0x214] sm:$0xf0]  ;;  %v3521_v8 = vor.u32 %v3813_v57, %v3520_v56  ;;  %v2466_v56 = vld [vmem:[#allocation7 + $0xb8] sm:$0xf0]  ;;  %v3456_v57 = vld [vmem:[#allocation7 + $0x868] sm:$0xf] }
  0xc4   :  { %2128 = vmatpush.bf16.msrb.mxu0 %v2721_v2  ;;  %v2897_v2 = vor.u32 %v3657_v54, %v2896_v53  ;;  %v2641_v9 = vor.u32 %v3593_v62, %v2640_v60  ;;  %v3344_v53 = vld [vmem:[#allocation7 + $0x788] sm:$0xf]  ;;  %v3769_v54 = vld [vmem:[#allocation7 + $0x794] sm:$0xf0]  ;;  %v3217_v60 = vor.u32 %v3737_v50, %v3216_v49  ;;  %v3651_v49 = vld [vmem:[#allocation7 + $0x3ec] sm:$0xf] }
  0xc5   :  { %2141 = vmatpush.bf16.msrb.mxu1 %v2849_v3  ;;  %v3264_v3 = vld [vmem:[#allocation7 + $0x6e8] sm:$0xf]  ;;  %v3345_v63 = vor.u32 %v3769_v54, %v3344_v53  ;;  %v3725_v34 = vld [vmem:[#allocation7 + $0x634] sm:$0xf0]  ;;  %v2882_v50 = vld [vmem:[#allocation7 + $0x3f8] sm:$0xf0] }
  0xc6   :  { %2166 = vmatpush.bf16.msrb.mxu3 %v3121_v6  ;;  %v3392_v6 = vld [vmem:[#allocation7 + $0x7e8] sm:$0xf]  ;;  %v3757_v39 = vld [vmem:[#allocation7 + $0x734] sm:$0xf0] }
  0xc7   :  { %2155 = vmatpush.bf16.msrb.mxu2 %v2961_v10  ;;  %v3504_v10 = vld [vmem:[#allocation7 + $0x8c8] sm:$0xf]  ;;  %v3393_v17 = vor.u32 %v3781_v7, %v3392_v6  ;;  %v3721_v54 = vld [vmem:[#allocation7 + $0x614] sm:$0xf0] }
  0xc8   :  { %2129 = vmatpush.bf16.msrb.mxu0 %v2705_v14  ;;  %v3265_v14 = vor.u32 %v3749_v4, %v3264_v3  ;;  %v3505_v23 = vor.u32 %v3809_v11, %v3504_v10  ;;  %v3543_v3 = vld [vmem:[#allocation7 + $0x8c] sm:$0xf]  ;;  %v3328_v4 = vld [vmem:[#allocation7 + $0x768] sm:$0xf]  ;;  %v3793_v10 = vld [vmem:[#allocation7 + $0x854] sm:$0xf0] }
  0xc9   :  { %2142 = vmatpush.bf16.msrb.mxu1 %v2833_v15  ;;  %v3041_v15 = vor.u32 %v3693_v5, %v3040_v59  ;;  %v3765_v5 = vld [vmem:[#allocation7 + $0x774] sm:$0xf0]  ;;  %v3152_v53 = vld [vmem:[#allocation7 + $0x608] sm:$0xf] }
  0xca   :  { %2167 = vmatpush.bf16.msrb.mxu3 %v3105_v18  ;;  %v3248_v18 = vld [vmem:[#allocation7 + $0x6c8] sm:$0xf]  ;;  %v3329_v13 = vor.u32 %v3765_v5, %v3328_v4  ;;  %v3153_v4 = vor.u32 %v3721_v54, %v3152_v53  ;;  %v3607_v54 = vld [vmem:[#allocation7 + $0x28c] sm:$0xf] }
  0xcb   :  { %2156 = vmatpush.bf16.msrb.mxu2 %v2945_v22  ;;  %v3777_v22 = vld [vmem:[#allocation7 + $0x7d4] sm:$0xf0] }
  0xcc   :  { %2130 = vmatpush.bf16.msrb.mxu0 %v2689_v28  ;;  %v3805_v28 = vld [vmem:[#allocation7 + $0x8b4] sm:$0xf0] }
  0xcd   :  { %2143 = vmatpush.bf16.msrb.mxu1 %v2817_v29  ;;  %v3249_v29 = vor.u32 %v3745_v19, %v3248_v18  ;;  %v3489_v42 = vor.u32 %v3805_v28, %v3488_v27  ;;  %v3312_v18 = vld [vmem:[#allocation7 + $0x748] sm:$0xf]  ;;  %v3761_v19 = vld [vmem:[#allocation7 + $0x754] sm:$0xf0] }
  0xce   :  { %2168 = vmatpush.bf16.msrb.mxu3 %v3089_v33  ;;  %v3377_v33 = vor.u32 %v3777_v22, %v3376_v21  ;;  %v2434_v22 = vld [vmem:[#allocation7 + $0x78] sm:$0xf0] }
  0xcf   :  { %2157 = vmatpush.bf16.msrb.mxu2 %v2929_v38  ;;  %v3551_v38 = vld [vmem:[#allocation7 + $0xcc] sm:$0xf] }
  0xd0   :  { %2131 = vmatpush.bf16.msrb.mxu0 %v2673_v43  ;;  %v2482_v43 = vld [vmem:[#allocation7 + $0xd8] sm:$0xf0] }
  0xd1   :  { %2144 = vmatpush.bf16.msrb.mxu1 %v2801_v44  ;;  %v3472_v44 = vld [vmem:[#allocation7 + $0x888] sm:$0xf] }
  0xd2   :  { %2169 = vmatpush.bf16.msrb.mxu3 %v3073_v47  ;;  %v418_v47 = vperm.slane %v4045_v32, 0 }
  0xd3   :  { %2158 = vmatpush.bf16.msrb.mxu2 %v2913_v51  ;;  %v2485_v51 = vor.u32 %v3551_v38, %v2482_v43  ;;  %v3296_v38 = vld [vmem:[#allocation7 + $0x728] sm:$0xf]  ;;  %v2418_v43 = vld [vmem:[#allocation7 + $0x58] sm:$0xf0] }
  0xd4   :  { %2132 = vmatpush.bf16.msrb.mxu0 %v2657_v55  ;;  %v3473_v55 = vor.u32 %v3801_v45, %v3472_v44  ;;  %v3408_v44 = vld [vmem:[#allocation7 + $0x808] sm:$0xf]  ;;  %v3785_v45 = vld [vmem:[#allocation7 + $0x814] sm:$0xf0] }
  0xd5   :  { %2145 = vmatpush.bf16.msrb.mxu1 %v2785_v58  ;;  %v3797_v58 = vld [vmem:[#allocation7 + $0x874] sm:$0xf0] }
  0xd6   :  { %2170 = vmatpush.bf16.msrb.mxu3 %v3057_v0  ;;  %v3200_v0 = vld [vmem:[#allocation7 + $0x668] sm:$0xf]  ;;  %v3457_v6 = vor.u32 %v3797_v58, %v3456_v57  ;;  %v3753_v57 = vld [vmem:[#allocation7 + $0x714] sm:$0xf0]  ;;  %v3409_v58 = vor.u32 %v3785_v45, %v3408_v44 }
  0xd7   :  { %2159 = vmatpush.bf16.msrb.mxu2 %v2897_v2  ;;  %v1875_v59 = vpop.f32.mrf.mxu0  ;;  %v2469_v2 = vor.u32 %v3547_v52, %v2466_v56  ;;  %v3531_v52 = vld [vmem:[#allocation7 + $0x2c] sm:$0xf] }
  0xd8   :  { %2133 = vmatpush.bf16.msrb.mxu0 %v2641_v9  ;;  %v1888_v62 = vpop.f32.mrf.mxu1  ;;  %v1876_v7 = vadd.f32 %v1875_v59, %v418_v47  ;;  %v3440_v9 = vld [vmem:[#allocation7 + $0x848] sm:$0xf]  ;;  %v3587_v59 = vld [vmem:[#allocation7 + $0x1ec] sm:$0xf] }
  0xd9   :  { %2146 = vmatpush.bf16.msrb.mxu1 %v2769_v12  ;;  %v3201_v12 = vor.u32 %v3733_v1, %v3200_v0  ;;  %v3441_v20 = vor.u32 %v3793_v10, %v3440_v9  ;;  %v3619_v0 = vld [vmem:[#allocation7 + $0x2ec] sm:$0xf]  ;;  %v2754_v1 = vld [vmem:[#allocation7 + $0x2f8] sm:$0xf0] }
  0xda   :  { %2171 = vmatpush.bf16.msrb.mxu3 %v3041_v15  ;;  %2160 = vmatmul.bf16.vlgmr.msrb.gmra.mxu2 %v4025_v25  ;;  %v3729_v15 = vld [vmem:[#allocation7 + $0x654] sm:$0xf0]  ;;  %v1889_v21 = vadd.f32 %v1888_v62, %v1876_v7  ;;  %v2866_v9 = vld [vmem:[#allocation7 + $0x3d8] sm:$0xf0] }
  0xdb   :  { %2204 = vmatpush.bf16.msra.mxu2 %v3521_v8  ;;  %2134 = vmatmul.bf16.vlgmr.msrb.gmra.mxu0 %v4013_v26  ;;  %v2450_v8 = vld [vmem:[#allocation7 + $0x98] sm:$0xf0]  ;;  %v1901_v11 = vpop.f32.mrf.mxu2 }
  0xdc   :  { %2178 = vmatpush.bf16.msra.mxu0 %v3265_v14  ;;  %2147 = vmatmul.bf16.vlgmr.msrb.gmra.mxu1 %v4022_v61  ;;  %v3184_v14 = vld [vmem:[#allocation7 + $0x648] sm:$0xf]  ;;  %v2453_v16 = vor.u32 %v3543_v3, %v2450_v8  ;;  %v3647_v8 = vld [vmem:[#allocation7 + $0x3cc] sm:$0xf] }
  0xdd   :  { %2191 = vmatpush.bf16.msra.mxu1 %v3393_v17  ;;  %v3539_v17 = vld [vmem:[#allocation7 + $0x6c] sm:$0xf]  ;;  %v3185_v28 = vor.u32 %v3729_v15, %v3184_v14  ;;  %v2610_v14 = vld [vmem:[#allocation7 + $0x1d8] sm:$0xf0] }
  0xde   :  { %2172 = vmatpush.bf16.msrb.mxu3 %v3025_v31  ;;  %v3313_v31 = vor.u32 %v3761_v19, %v3312_v18  ;;  %v2437_v35 = vor.u32 %v3539_v17, %v2434_v22  ;;  %v3615_v17 = vld [vmem:[#allocation7 + $0x2cc] sm:$0xf]  ;;  %v2738_v18 = vld [vmem:[#allocation7 + $0x2d8] sm:$0xf0] }
  0xdf   :  { %2205 = vmatpush.bf16.msra.mxu2 %v3505_v23  ;;  %v3424_v23 = vld [vmem:[#allocation7 + $0x828] sm:$0xf]  ;;  %v1877_v27 = vpop.f32.mrf.mxu0  ;;  %v3010_v22 = vld [vmem:[#allocation7 + $0x4f8] sm:$0xf0] }
  0xe0   :  { %2179 = vmatpush.bf16.msra.mxu0 %v3249_v29  ;;  %v1890_v29 = vpop.f32.mrf.mxu1  ;;  %v3425_v40 = vor.u32 %v3789_v24, %v3424_v23  ;;  %v2869_v23 = vor.u32 %v3647_v8, %v2866_v9  ;;  %v3643_v27 = vld [vmem:[#allocation7 + $0x3ac] sm:$0xf] }
  0xe1   :  { %2192 = vmatpush.bf16.msra.mxu1 %v3377_v33  ;;  %2173 = vmatmul.bf16.vlgmr.msrb.gmra.mxu3 %v4027_v30  ;;  %v3168_v33 = vld [vmem:[#allocation7 + $0x628] sm:$0xf]  ;;  %v3671_v9 = vld [vmem:[#allocation7 + $0x48c] sm:$0xf] }
  0xe2   :  { %2217 = vmatpush.bf16.msra.mxu3 %v2501_v37  ;;  %v3535_v37 = vld [vmem:[#allocation7 + $0x4c] sm:$0xf] }
  0xe3   :  { %2206 = vmatpush.bf16.msra.mxu2 %v3489_v42  ;;  %v1902_v42 = vadd.f32 %v1901_v11, %v1889_v21  ;;  %v1903_v47 = vpop.f32.mrf.mxu2  ;;  %v2421_v56 = vor.u32 %v3535_v37, %v2418_v43  ;;  %v3527_v11 = vld [vmem:[#allocation7 + $0xc] sm:$0xf]  ;;  %v2994_v43 = vld [vmem:[#allocation7 + $0x4d8] sm:$0xf0] }
  0xe4   :  { %2180 = vmatpush.bf16.msra.mxu0 %v3233_v46  ;;  %v1914_v46 = vpop.f32.mrf.mxu3  ;;  %v3683_v21 = vld [vmem:[#allocation7 + $0x4ec] sm:$0xf]  ;;  %v2834_v47 = vld [vmem:[#allocation7 + $0x398] sm:$0xf0] }
  0xe5   :  { %2193 = vmatpush.bf16.msra.mxu1 %v3361_v48  ;;  %v3169_v48 = vor.u32 %v3725_v34, %v3168_v33  ;;  %v1915_v62 = vadd.f32 %v1914_v46, %v1902_v42  ;;  %v3579_v33 = vld [vmem:[#allocation7 + $0x1ac] sm:$0xf]  ;;  %v2594_v34 = vld [vmem:[#allocation7 + $0x1b8] sm:$0xf0]  ;;  %v3013_v37 = vor.u32 %v3683_v21, %v3010_v22 }
  0xe6   :  { %2218 = vmatpush.bf16.msra.mxu3 %v2485_v51  ;;  %v3297_v51 = vor.u32 %v3757_v39, %v3296_v38  ;;  %v3611_v38 = vld [vmem:[#allocation7 + $0x2ac] sm:$0xf]  ;;  %v2722_v39 = vld [vmem:[#allocation7 + $0x2b8] sm:$0xf0]  ;;  %v2597_v45 = vor.u32 %v3579_v33, %v2594_v34 }
  0xe7   :  { %2207 = vmatpush.bf16.msra.mxu2 %v3473_v55  ;;  %v3280_v55 = vld [vmem:[#allocation7 + $0x708] sm:$0xf]  ;;  %v1927_v3 = vpop.f32.mrf.mxu0  ;;  %v3679_v42 = vld [vmem:[#allocation7 + $0x4cc] sm:$0xf]  ;;  %v2674_v22 = vld [vmem:[#allocation7 + $0x258] sm:$0xf0] }
  0xe8   :  { %2181 = vmatpush.bf16.msra.mxu0 %v3217_v60  ;;  %v2626_v60 = vld [vmem:[#allocation7 + $0x1f8] sm:$0xf0]  ;;  %v1940_v5 = vpop.f32.mrf.mxu1  ;;  %v1928_v15 = vadd.f32 %v1927_v3, %v1915_v62  ;;  %v3639_v46 = vld [vmem:[#allocation7 + $0x38c] sm:$0xf]  ;;  %v2997_v53 = vor.u32 %v3679_v42, %v2994_v43 }
  0xe9   :  { %2194 = vmatpush.bf16.msra.mxu1 %v3345_v63  ;;  %v2402_v63 = vld [vmem:[#allocation7 + $0x38] sm:$0xf0]  ;;  %v2629_v7 = vor.u32 %v3587_v59, %v2626_v60  ;;  %v2837_v59 = vor.u32 %v3639_v46, %v2834_v47  ;;  %v3599_v21 = vld [vmem:[#allocation7 + $0x24c] sm:$0xf] }
  0xea   :  { %2219 = vmatpush.bf16.msra.mxu3 %v2469_v2  ;;  %v2885_v2 = vor.u32 %v3651_v49, %v2882_v50  ;;  %v2405_v10 = vor.u32 %v3531_v52, %v2402_v63  ;;  %v2725_v49 = vor.u32 %v3611_v38, %v2722_v39  ;;  %v3575_v50 = vld [vmem:[#allocation7 + $0x18c] sm:$0xf]  ;;  %v2562_v3 = vld [vmem:[#allocation7 + $0x178] sm:$0xf0]  ;;  %v2677_v34 = vor.u32 %v3599_v21, %v2674_v22 }
  0xeb   :  { %2208 = vmatpush.bf16.msra.mxu2 %v3457_v6  ;;  %v3281_v6 = vor.u32 %v3753_v57, %v3280_v55  ;;  %v2706_v55 = vld [vmem:[#allocation7 + $0x298] sm:$0xf0]  ;;  %v3675_v57 = vld [vmem:[#allocation7 + $0x4ac] sm:$0xf] }
  0xec   :  { %2182 = vmatpush.bf16.msra.mxu0 %v3201_v12  ;;  %v2757_v12 = vor.u32 %v3619_v0, %v2754_v1  ;;  %v1916_v19 = vpop.f32.mrf.mxu3  ;;  %v3635_v63 = vld [vmem:[#allocation7 + $0x36c] sm:$0xf]  ;;  %v2818_v0 = vld [vmem:[#allocation7 + $0x378] sm:$0xf0]  ;;  %v2709_v1 = vor.u32 %v3607_v54, %v2706_v55 }
  0xed   :  { %2195 = vmatpush.bf16.msra.mxu1 %v3329_v13  ;;  %v3583_v13 = vld [vmem:[#allocation7 + $0x1cc] sm:$0xf]  ;;  %v2546_v19 = vld [vmem:[#allocation7 + $0x158] sm:$0xf0] }
  0xee   :  { %2220 = vmatpush.bf16.msra.mxu3 %v2453_v16  ;;  %v2386_v16 = vld [vmem:[#allocation7 + $0x18] sm:$0xf0]  ;;  %v2613_v24 = vor.u32 %v3583_v13, %v2610_v14  ;;  %v3631_v14 = vld [vmem:[#allocation7 + $0x34c] sm:$0xf] }
  0xef   :  { %2209 = vmatpush.bf16.msra.mxu2 %v3441_v20  ;;  %v1953_v20 = vpop.f32.mrf.mxu2  ;;  %v2389_v29 = vor.u32 %v3527_v11, %v2386_v16  ;;  %v2821_v11 = vor.u32 %v3635_v63, %v2818_v0  ;;  %v2786_v33 = vld [vmem:[#allocation7 + $0x338] sm:$0xf0]  ;;  %v3663_v39 = vld [vmem:[#allocation7 + $0x44c] sm:$0xf] }
  0xf0   :  { %2183 = vmatpush.bf16.msra.mxu0 %v3185_v28  ;;  %v2850_v28 = vld [vmem:[#allocation7 + $0x3b8] sm:$0xf0]  ;;  %v3559_v46 = vld [vmem:[#allocation7 + $0x10c] sm:$0xf] }
  0xf1   :  { %2196 = vmatpush.bf16.msra.mxu1 %v3313_v31  ;;  %v2741_v31 = vor.u32 %v3615_v17, %v2738_v18  ;;  %v2853_v44 = vor.u32 %v3643_v27, %v2850_v28  ;;  %v3567_v18 = vld [vmem:[#allocation7 + $0x14c] sm:$0xf]  ;;  %v2658_v42 = vld [vmem:[#allocation7 + $0x238] sm:$0xf0] }
  0xf2   :  { %2221 = vmatpush.bf16.msra.mxu3 %v2437_v35  ;;  %v1941_v35 = vadd.f32 %v1940_v5, %v1928_v15  ;;  %v2802_v15 = vld [vmem:[#allocation7 + $0x358] sm:$0xf0]  ;;  %v3715_v0 = vld [vmem:[#allocation7 + $0x5ec] sm:$0xf] }
  0xf3   :  { %2210 = vmatpush.bf16.msra.mxu2 %v3425_v40  ;;  %v1929_v40 = vpop.f32.mrf.mxu0  ;;  %v2805_v28 = vor.u32 %v3631_v14, %v2802_v15  ;;  %v2514_v47 = vld [vmem:[#allocation7 + $0x118] sm:$0xf0]  ;;  %v3655_v14 = vld [vmem:[#allocation7 + $0x40c] sm:$0xf] }
  0xf4   :  { %2184 = vmatpush.bf16.msra.mxu0 %v3169_v48  ;;  %v1942_v48 = vpop.f32.mrf.mxu1  ;;  %v1954_v52 = vadd.f32 %v1953_v20, %v1941_v35  ;;  %v3563_v35 = vld [vmem:[#allocation7 + $0x12c] sm:$0xf]  ;;  %v2642_v63 = vld [vmem:[#allocation7 + $0x218] sm:$0xf0] }
  0xf5   :  { %2197 = vmatpush.bf16.msra.mxu1 %v3297_v51  ;;  %v2578_v51 = vld [vmem:[#allocation7 + $0x198] sm:$0xf0]  ;;  %v3595_v40 = vld [vmem:[#allocation7 + $0x22c] sm:$0xf] }
  0xf6   :  { %2222 = vmatpush.bf16.msra.mxu3 %v2421_v56  ;;  %v1966_v56 = vpop.f32.mrf.mxu3  ;;  %v2581_v62 = vor.u32 %v3575_v50, %v2578_v51  ;;  %v3591_v51 = vld [vmem:[#allocation7 + $0x20c] sm:$0xf]  ;;  %v3250_v22 = vld [vmem:[#allocation7 + $0x6d8] sm:$0xf0] }
  0xf7   :  { %2211 = vmatpush.bf16.msra.mxu2 %v3409_v58  ;;  %v2978_v58 = vld [vmem:[#allocation7 + $0x4b8] sm:$0xf0]  ;;  %v1955_v60 = vpop.f32.mrf.mxu2  ;;  %v3743_v21 = vld [vmem:[#allocation7 + $0x6cc] sm:$0xf] }
  0xf8   :  { %2185 = vmatpush.bf16.msra.mxu0 %v3153_v4  ;;  %v1967_v4 = vadd.f32 %v1966_v56, %v1954_v52  ;;  %v2981_v5 = vor.u32 %v3675_v57, %v2978_v58  ;;  %v3623_v52 = vld [vmem:[#allocation7 + $0x30c] sm:$0xf]  ;;  %v2661_v56 = vor.u32 %v3595_v40, %v2658_v42  ;;  %v2914_v58 = vld [vmem:[#allocation7 + $0x438] sm:$0xf0] }
  0xf9   :  { %2198 = vmatpush.bf16.msra.mxu1 %v3281_v6  ;;  %v3603_v6 = vld [vmem:[#allocation7 + $0x26c] sm:$0xf]  ;;  %v3394_v60 = vld [vmem:[#allocation7 + $0x7f8] sm:$0xf0] }
  0xfa   :  { %2223 = vmatpush.bf16.msra.mxu3 %v2405_v10  ;;  %2212 = vmatmul.bf16.vlgmr.msra.gmra.mxu2 %v4013_v26  ;;  %v2962_v10 = vld [vmem:[#allocation7 + $0x498] sm:$0xf0]  ;;  %v3659_v57 = vld [vmem:[#allocation7 + $0x42c] sm:$0xf] }
  0xfb   :  { %2256 = vmatpush.bf16.msrb.mxu2 %v2885_v2  ;;  %2186 = vmatmul.bf16.vlgmr.msra.gmra.mxu0 %v4016_v36  ;;  %v3571_v2 = vld [vmem:[#allocation7 + $0x16c] sm:$0xf]  ;;  %v1979_v8 = vpop.f32.mrf.mxu0  ;;  %v2965_v20 = vor.u32 %v3671_v9, %v2962_v10  ;;  %v2645_v9 = vor.u32 %v3591_v51, %v2642_v63  ;;  %v3234_v40 = vld [vmem:[#allocation7 + $0x6b8] sm:$0xf0] }
  0xfc   :  { %2230 = vmatpush.bf16.msrb.mxu0 %v2629_v7  ;;  %2199 = vmatmul.bf16.vlgmr.msra.gmra.mxu1 %v4018_v41  ;;  %v2690_v7 = vld [vmem:[#allocation7 + $0x278] sm:$0xf0]  ;;  %v2565_v13 = vor.u32 %v3571_v2, %v2562_v3  ;;  %v4056_v16 = vpop.f32.mrf.mxu1  ;;  %v3703_v51 = vld [vmem:[#allocation7 + $0x58c] sm:$0xf] }
  0xfd   :  { %2243 = vmatpush.bf16.msrb.mxu1 %v2757_v12  ;;  %v1980_v12 = vadd.f32 %v1979_v8, %v1967_v4  ;;  %v2693_v17 = vor.u32 %v3603_v6, %v2690_v7  ;;  %v3747_v4 = vld [vmem:[#allocation7 + $0x6ec] sm:$0xf]  ;;  %v2517_v7 = vor.u32 %v3559_v46, %v2514_v47 }
  0xfe   :  { %2224 = vmatpush.bf16.msra.mxu3 %v2389_v29  ;;  %v1968_v27 = vpop.f32.mrf.mxu3  ;;  %v2549_v29 = vor.u32 %v3567_v18, %v2546_v19  ;;  %v3122_v18 = vld [vmem:[#allocation7 + $0x5d8] sm:$0xf0]  ;;  %v3699_v63 = vld [vmem:[#allocation7 + $0x56c] sm:$0xf] }
  0xff   :  { %2257 = vmatpush.bf16.msrb.mxu2 %v2869_v23  ;;  %3827 = vtanh.f32 %v1980_v12  ;;  %v3667_v23 = vld [vmem:[#allocation7 + $0x46c] sm:$0xf]  ;;  %v4058_v43 = vpop.f32.mrf.mxu2  ;;  %v3378_v12 = vld [vmem:[#allocation7 + $0x7d8] sm:$0xf0] }
 0x100   :  { %2231 = vmatpush.bf16.msrb.mxu0 %v2613_v24  ;;  %v2946_v24 = vld [vmem:[#allocation7 + $0x478] sm:$0xf0] }
 0x101   :  { %2244 = vmatpush.bf16.msrb.mxu1 %v2741_v31  ;;  %2225 = vmatmul.bf16.vlgmr.msra.gmra.mxu3 %v4016_v36  ;;  %v3627_v31 = vld [vmem:[#allocation7 + $0x32c] sm:$0xf]  ;;  %v2949_v38 = vor.u32 %v3667_v23, %v2946_v24  ;;  %v3522_v24 = vld [vmem:[#allocation7 + $0x8f8] sm:$0xf0] }
 0x102   :  { %2269 = vmatpush.bf16.msrb.mxu3 %v3013_v37  ;;  %v2530_v37 = vld [vmem:[#allocation7 + $0x138] sm:$0xf0]  ;;  %v3811_v23 = vld [vmem:[#allocation7 + $0x8ec] sm:$0xf] }
 0x103   :  { %2258 = vmatpush.bf16.msrb.mxu2 %v2853_v44  ;;  %v2930_v44 = vld [vmem:[#allocation7 + $0x458] sm:$0xf0]  ;;  %v1981_v48 = vpop.f32.mrf.mxu0  ;;  %v2533_v50 = vor.u32 %v3563_v35, %v2530_v37  ;;  %v3707_v35 = vld [vmem:[#allocation7 + $0x5ac] sm:$0xf] }
 0x104   :  { %2232 = vmatpush.bf16.msrb.mxu0 %v2597_v45  ;;  %v2789_v45 = vor.u32 %v3627_v31, %v2786_v33  ;;  %v1994_v54 = vpop.f32.mrf.mxu1  ;;  %v3362_v31 = vld [vmem:[#allocation7 + $0x7b8] sm:$0xf0]  ;;  %v3767_v48 = vld [vmem:[#allocation7 + $0x78c] sm:$0xf] }
 0x105   :  { %2245 = vmatpush.bf16.msrb.mxu1 %v2725_v49  ;;  %v3828_v49 = vpop.eup %3827  ;;  %v3106_v37 = vld [vmem:[#allocation7 + $0x5b8] sm:$0xf0] }
 0x106   :  { %2270 = vmatpush.bf16.msrb.mxu3 %v2997_v53  ;;  %v2770_v53 = vld [vmem:[#allocation7 + $0x318] sm:$0xf0]  ;;  %v2338_v55 = vmul.f32 0.5, %v3828_v49  ;;  %v4060_v6 = vpop.f32.mrf.mxu3  ;;  %v3109_v47 = vor.u32 %v3707_v35, %v3106_v37  ;;  %v3723_v37 = vld [vmem:[#allocation7 + $0x62c] sm:$0xf] }
 0x107   :  { %2259 = vmatpush.bf16.msrb.mxu2 %v2837_v59  ;;  %v3779_v59 = vld [vmem:[#allocation7 + $0x7ec] sm:$0xf]  ;;  %v2773_v3 = vor.u32 %v3623_v52, %v2770_v53  ;;  %v2007_v19 = vpop.f32.mrf.mxu2  ;;  %v3346_v49 = vld [vmem:[#allocation7 + $0x798] sm:$0xf0] }
 0x108   :  { %2233 = vmatpush.bf16.msrb.mxu0 %v2581_v62  ;;  %v2933_v62 = vor.u32 %v3663_v39, %v2930_v44  ;;  %v2342_v2 = vadd.f32 0.5, %v2338_v55  ;;  %v3397_v8 = vor.u32 %v3779_v59, %v3394_v60  ;;  %v3739_v39 = vld [vmem:[#allocation7 + $0x6ac] sm:$0xf]  ;;  %v3218_v54 = vld [vmem:[#allocation7 + $0x698] sm:$0xf0] }
 0x109   :  { %2246 = vmatpush.bf16.msrb.mxu1 %v2709_v1  ;;  %v3138_v1 = vld [vmem:[#allocation7 + $0x5f8] sm:$0xf0]  ;;  %v3807_v44 = vld [vmem:[#allocation7 + $0x8cc] sm:$0xf] }
 0x10a   :  { %2271 = vmatpush.bf16.msrb.mxu3 %v2981_v5  ;;  %v3266_v5 = vld [vmem:[#allocation7 + $0x6f8] sm:$0xf0]  ;;  %2346 = vst [vmem:[#allocation10] sm:$0xff] %v2342_v2  ;;  %v3141_v10 = vor.u32 %v3715_v0, %v3138_v1  ;;  %v3735_v53 = vld [vmem:[#allocation7 + $0x68c] sm:$0xf] }
 0x10b   :  { %2260 = vmatpush.bf16.msrb.mxu2 %v2821_v11  ;;  %v3775_v11 = vld [vmem:[#allocation7 + $0x7cc] sm:$0xf]  ;;  %v3269_v15 = vor.u32 %v3747_v4, %v3266_v5  ;;  %v3330_v60 = vld [vmem:[#allocation7 + $0x778] sm:$0xf0]  ;;  %v419_v4 = vperm.slane %v4045_v32, 1 }
 0x10c   :  { %2234 = vmatpush.bf16.msrb.mxu0 %v2565_v13  ;;  %v2917_v13 = vor.u32 %v3659_v57, %v2914_v58  ;;  %v3381_v27 = vor.u32 %v3775_v11, %v3378_v12  ;;  %v3803_v55 = vld [vmem:[#allocation7 + $0x8ac] sm:$0xf]  ;;  %v3349_v57 = vor.u32 %v3767_v48, %v3346_v49  ;;  %v3074_v0 = vld [vmem:[#allocation7 + $0x578] sm:$0xf0] }
 0x10d   :  { %2247 = vmatpush.bf16.msrb.mxu1 %v2693_v17  ;;  %v3711_v17 = vld [vmem:[#allocation7 + $0x5cc] sm:$0xf]  ;;  %v3314_v11 = vld [vmem:[#allocation7 + $0x758] sm:$0xf0] }
 0x10e   :  { %2272 = vmatpush.bf16.msrb.mxu3 %v2965_v20  ;;  %v2898_v20 = vld [vmem:[#allocation7 + $0x418] sm:$0xf0]  ;;  %v2020_v42 = vpop.f32.mrf.mxu3  ;;  %v3763_v59 = vld [vmem:[#allocation7 + $0x76c] sm:$0xf] }
 0x10f   :  { %2261 = vmatpush.bf16.msrb.mxu2 %v2805_v28  ;;  %v3125_v28 = vor.u32 %v3711_v17, %v3122_v18  ;;  %v2901_v33 = vor.u32 %v3655_v14, %v2898_v20  ;;  %v3731_v2 = vld [vmem:[#allocation7 + $0x66c] sm:$0xf]  ;;  %v3186_v19 = vld [vmem:[#allocation7 + $0x658] sm:$0xf0]  ;;  %v1993_v20 = vadd.f32 %v4056_v16, %v419_v4 }
 0x110   :  { %2235 = vmatpush.bf16.msrb.mxu0 %v2549_v29  ;;  %v3771_v29 = vld [vmem:[#allocation7 + $0x7ac] sm:$0xf] }
 0x111   :  { %2248 = vmatpush.bf16.msrb.mxu1 %v2677_v34  ;;  %v3253_v34 = vor.u32 %v3743_v21, %v3250_v22  ;;  %v3365_v46 = vor.u32 %v3771_v29, %v3362_v31  ;;  %v3799_v5 = vld [vmem:[#allocation7 + $0x88c] sm:$0xf]  ;;  %v3458_v22 = vld [vmem:[#allocation7 + $0x878] sm:$0xf0] }
 0x112   :  { %2273 = vmatpush.bf16.msrb.mxu3 %v2949_v38  ;;  %v3525_v38 = vor.u32 %v3811_v23, %v3522_v24  ;;  %v3695_v14 = vld [vmem:[#allocation7 + $0x54c] sm:$0xf] }
 0x113   :  { %2262 = vmatpush.bf16.msrb.mxu2 %v2789_v45  ;;  %v3506_v45 = vld [vmem:[#allocation7 + $0x8d8] sm:$0xf0]  ;;  %v3727_v18 = vld [vmem:[#allocation7 + $0x64c] sm:$0xf] }
 0x114   :  { %2236 = vmatpush.bf16.msrb.mxu0 %v2533_v50  ;;  %v3237_v50 = vor.u32 %v3739_v39, %v3234_v40  ;;  %v3509_v52 = vor.u32 %v3807_v44, %v3506_v45  ;;  %v3795_v21 = vld [vmem:[#allocation7 + $0x86c] sm:$0xf]  ;;  %v3189_v29 = vor.u32 %v3727_v18, %v3186_v19  ;;  %v2006_v39 = vadd.f32 %v4058_v43, %v1993_v20  ;;  %v3442_v40 = vld [vmem:[#allocation7 + $0x858] sm:$0xf0] }
 0x115   :  { %2249 = vmatpush.bf16.msrb.mxu1 %v2661_v56  ;;  %v3490_v56 = vld [vmem:[#allocation7 + $0x8b8] sm:$0xf0]  ;;  %v3691_v31 = vld [vmem:[#allocation7 + $0x52c] sm:$0xf] }
 0x116   :  { %2274 = vmatpush.bf16.msrb.mxu3 %v2933_v62  ;;  %v3221_v62 = vor.u32 %v3735_v53, %v3218_v54  ;;  %v3493_v1 = vor.u32 %v3803_v55, %v3490_v56  ;;  %v3791_v16 = vld [vmem:[#allocation7 + $0x84c] sm:$0xf]  ;;  %v3154_v53 = vld [vmem:[#allocation7 + $0x618] sm:$0xf0]  ;;  %v2019_v43 = vadd.f32 %v4060_v6, %v2006_v39 }
 0x117   :  { %2263 = vmatpush.bf16.msrb.mxu2 %v2773_v3  ;;  %v3202_v3 = vld [vmem:[#allocation7 + $0x678] sm:$0xf0]  ;;  %v3787_v54 = vld [vmem:[#allocation7 + $0x82c] sm:$0xf] }
 0x118   :  { %2237 = vmatpush.bf16.msrb.mxu0 %v2517_v7  ;;  %v3474_v7 = vld [vmem:[#allocation7 + $0x898] sm:$0xf0] }
 0x119   :  { %2250 = vmatpush.bf16.msrb.mxu1 %v2645_v9  ;;  %v4067_v9 = vpop.f32.mrf.mxu0  ;;  %v4069_v12 = vpop.f32.mrf.mxu1  ;;  %v3477_v17 = vor.u32 %v3799_v5, %v3474_v7  ;;  %v3426_v55 = vld [vmem:[#allocation7 + $0x838] sm:$0xf0] }
 0x11a   :  { %2275 = vmatpush.bf16.msrb.mxu3 %v2917_v13  ;;  %2264 = vmatmul.bf16.vlgmr.msrb.gmra.mxu2 %v4022_v61  ;;  %v3090_v61 = vld [vmem:[#allocation7 + $0x598] sm:$0xf0]  ;;  %v3205_v13 = vor.u32 %v3731_v2, %v3202_v3 }
 0x11b   :  { %2308 = vmatpush.bf16.msra.mxu2 %v3397_v8  ;;  %2238 = vmatmul.bf16.vlgmr.msrb.gmra.mxu0 %v4018_v41  ;;  %v3093_v58 = vor.u32 %v3703_v51, %v3090_v61  ;;  %v3333_v8 = vor.u32 %v3763_v59, %v3330_v60  ;;  %v3026_v51 = vld [vmem:[#allocation7 + $0x518] sm:$0xf0]  ;;  %v3445_v61 = vor.u32 %v3791_v16, %v3442_v40 }
 0x11c   :  { %2282 = vmatpush.bf16.msra.mxu0 %v3141_v10  ;;  %2251 = vmatmul.bf16.vlgmr.msrb.gmra.mxu1 %v4013_v26  ;;  %v3759_v10 = vld [vmem:[#allocation7 + $0x74c] sm:$0xf]  ;;  %v3429_v60 = vor.u32 %v3787_v54, %v3426_v55  ;;  %v421_v54 = vperm.slane %v4045_v32, 3 }
 0x11d   :  { %2295 = vmatpush.bf16.msra.mxu1 %v3269_v15  ;;  %v3058_v15 = vld [vmem:[#allocation7 + $0x558] sm:$0xf0]  ;;  %v3317_v23 = vor.u32 %v3759_v10, %v3314_v11  ;;  %v2057_v35 = vpop.f32.mrf.mxu2 }
 0x11e   :  { %2276 = vmatpush.bf16.msrb.mxu3 %v2901_v33  ;;  %v3061_v24 = vor.u32 %v3695_v14, %v3058_v15  ;;  %v3042_v33 = vld [vmem:[#allocation7 + $0x538] sm:$0xf0] }
 0x11f   :  { %2309 = vmatpush.bf16.msra.mxu2 %v3381_v27  ;;  %v3755_v27 = vld [vmem:[#allocation7 + $0x72c] sm:$0xf]  ;;  %v3045_v45 = vor.u32 %v3691_v31, %v3042_v33 }
 0x120   :  { %2283 = vmatpush.bf16.msra.mxu0 %v3125_v28  ;;  %v3298_v28 = vld [vmem:[#allocation7 + $0x738] sm:$0xf0] }
 0x121   :  { %2296 = vmatpush.bf16.msra.mxu1 %v3253_v34  ;;  %2277 = vmatmul.bf16.vlgmr.msrb.gmra.mxu3 %v4025_v25  ;;  %v3077_v25 = vor.u32 %v3699_v63, %v3074_v0  ;;  %v3461_v34 = vor.u32 %v3795_v21, %v3458_v22  ;;  %v3301_v42 = vor.u32 %v3755_v27, %v3298_v28  ;;  %v2033_v44 = vpop.f32.mrf.mxu0  ;;  %v2046_v48 = vpop.f32.mrf.mxu1  ;;  %v3783_v0 = vld [vmem:[#allocation7 + $0x80c] sm:$0xf] }
 0x122   :  { %2321 = vmatpush.bf16.msra.mxu3 %v3525_v38  ;;  %v3170_v38 = vld [vmem:[#allocation7 + $0x638] sm:$0xf0]  ;;  %v2032_v63 = vadd.f32 %v4067_v9, %v2019_v43 }
 0x123   :  { %2310 = vmatpush.bf16.msra.mxu2 %v3365_v46  ;;  %v3751_v46 = vld [vmem:[#allocation7 + $0x70c] sm:$0xf]  ;;  %v3173_v49 = vor.u32 %v3723_v37, %v3170_v38 }
 0x124   :  { %2284 = vmatpush.bf16.msra.mxu0 %v3109_v47  ;;  %v3282_v47 = vld [vmem:[#allocation7 + $0x718] sm:$0xf0]  ;;  %v2070_v56 = vpop.f32.mrf.mxu3  ;;  %v2045_v2 = vadd.f32 %v4069_v12, %v2032_v63 }
 0x125   :  { %2297 = vmatpush.bf16.msra.mxu1 %v3237_v50  ;;  %v3687_v50 = vld [vmem:[#allocation7 + $0x50c] sm:$0xf] }
 0x126   :  { %2322 = vmatpush.bf16.msra.mxu3 %v3509_v52  ;;  %v3719_v52 = vld [vmem:[#allocation7 + $0x60c] sm:$0xf]  ;;  %v2058_v4 = vadd.f32 %v2057_v35, %v2045_v2 }
 0x127   :  { %2311 = vmatpush.bf16.msra.mxu2 %v3349_v57  ;;  %v3285_v57 = vor.u32 %v3751_v46, %v3282_v47  ;;  %v3157_v59 = vor.u32 %v3719_v52, %v3154_v53 }
 0x128   :  { %2285 = vmatpush.bf16.msra.mxu0 %v3093_v58  ;;  %v3029_v58 = vor.u32 %v3687_v50, %v3026_v51  ;;  %v2071_v5 = vadd.f32 %v2070_v56, %v2058_v4 }
 0x129   :  { %2298 = vmatpush.bf16.msra.mxu1 %v3221_v62  ;;  %v2059_v62 = vpop.f32.mrf.mxu2 }
 0x12a   :  { %2323 = vmatpush.bf16.msra.mxu3 %v3493_v1  ;;  %v3410_v1 = vld [vmem:[#allocation7 + $0x818] sm:$0xf0] }
 0x12b   :  { %2312 = vmatpush.bf16.msra.mxu2 %v3333_v8  ;;  %v3413_v6 = vor.u32 %v3783_v0, %v3410_v1 }
 0x12c   :  { %2286 = vmatpush.bf16.msra.mxu0 %v3077_v25  ;;  %v2072_v3 = vpop.f32.mrf.mxu3 }
 0x12d   :  { %2299 = vmatpush.bf16.msra.mxu1 %v3205_v13 }
 0x12e   :  { %2324 = vmatpush.bf16.msra.mxu3 %v3477_v17 }
 0x12f   :  { %2313 = vmatpush.bf16.msra.mxu2 %v3317_v23 }
 0x130   :  { %2287 = vmatpush.bf16.msra.mxu0 %v3061_v24 }
 0x131   :  { %2300 = vmatpush.bf16.msra.mxu1 %v3189_v29 }
 0x132   :  { %2325 = vmatpush.bf16.msra.mxu3 %v3461_v34 }
 0x133   :  { %2314 = vmatpush.bf16.msra.mxu2 %v3301_v42 }
 0x134   :  { %2288 = vmatpush.bf16.msra.mxu0 %v3045_v45 }
 0x135   :  { %2301 = vmatpush.bf16.msra.mxu1 %v3173_v49 }
 0x136   :  { %2326 = vmatpush.bf16.msra.mxu3 %v3445_v61 }
 0x137   :  { %2315 = vmatpush.bf16.msra.mxu2 %v3285_v57 }
 0x138   :  { %2289 = vmatpush.bf16.msra.mxu0 %v3029_v58  ;;  %v2083_v7 = vpop.f32.mrf.mxu0 }
 0x139   :  { %2302 = vmatpush.bf16.msra.mxu1 %v3157_v59  ;;  %v2084_v8 = vadd.f32 %v2083_v7, %v2071_v5  ;;  %v2096_v9 = vpop.f32.mrf.mxu1 }
 0x13a   :  { %2327 = vmatpush.bf16.msra.mxu3 %v3429_v60  ;;  %2316 = vmatmul.bf16.vlgmr.msra.gmra.mxu2 %v4018_v41 }
 0x13b   :  { %2290 = vmatmul.bf16.vlgmr.msra.gmra.mxu0 %v4027_v30  ;;  %v2097_v25 = vadd.f32 %v2096_v9, %v2084_v8 }
 0x13c   :  { %2303 = vmatmul.bf16.vlgmr.msra.gmra.mxu1 %v4016_v36 }
 0x13d   :  { %3829 = vtanh.f32 %v2097_v25  ;;  %v2109_v10 = vpop.f32.mrf.mxu2 }
 0x13e   :  { %2328 = vmatpush.bf16.msra.mxu3 %v3413_v6 }
 0x140   :  { %v2085_v11 = vpop.f32.mrf.mxu0 }
 0x141   :  { %2329 = vmatmul.bf16.vlgmr.msra.gmra.mxu3 %v4013_v26  ;;  %v2098_v41 = vpop.f32.mrf.mxu1  ;;  %v420_v26 = vperm.slane %v4045_v32, 2 }
 0x143   :  { %v3830_v13 = vpop.eup %3829  ;;  %v2110_v20 = vadd.f32 %v2109_v10, %v420_v26 }
 0x144   :  { %v2339_v12 = vmul.f32 0.5, %v3830_v13  ;;  %v2122_v14 = vpop.f32.mrf.mxu3 }
 0x145   :  { %v2111_v15 = vpop.f32.mrf.mxu2  ;;  %v2123_v23 = vadd.f32 %v2122_v14, %v2110_v20 }
 0x146   :  { %v2343_v30 = vadd.f32 0.5, %v2339_v12 }
 0x148   :  { %2347 = vst [vmem:[#allocation10 + $0x8] sm:$0xff] %v2343_v30 }
 0x14c   :  { %v2124_v36 = vpop.f32.mrf.mxu3 }
 0x158   :  { %v2135_v17 = vpop.f32.mrf.mxu0 }
 0x159   :  { %v2148_v18 = vpop.f32.mrf.mxu1  ;;  %v2136_v28 = vadd.f32 %v2135_v17, %v2123_v23 }
 0x15b   :  { %v2149_v29 = vadd.f32 %v2148_v18, %v2136_v28 }
 0x15d   :  { %v2161_v19 = vpop.f32.mrf.mxu2 }
 0x15e   :  { %v2162_v33 = vadd.f32 %v2161_v19, %v2149_v29 }
 0x160   :  { %v2137_v21 = vpop.f32.mrf.mxu0 }
 0x161   :  { %v2150_v22 = vpop.f32.mrf.mxu1 }
 0x164   :  { %v2174_v24 = vpop.f32.mrf.mxu3 }
 0x165   :  { %v2163_v27 = vpop.f32.mrf.mxu2  ;;  %v2175_v34 = vadd.f32 %v2174_v24, %v2162_v33 }
 0x16c   :  { %v2176_v31 = vpop.f32.mrf.mxu3 }
 0x178   :  { %v2187_v35 = vpop.f32.mrf.mxu0 }
 0x179   :  { %v2188_v37 = vadd.f32 %v2187_v35, %v2175_v34  ;;  %v2200_v38 = vpop.f32.mrf.mxu1 }
 0x17b   :  { %v2201_v39 = vadd.f32 %v2200_v38, %v2188_v37 }
 0x17d   :  { %v2213_v16 = vpop.f32.mrf.mxu2 }
 0x17e   :  { %v2214_v40 = vadd.f32 %v2213_v16, %v2201_v39 }
 0x180   :  { %v2189_v42 = vpop.f32.mrf.mxu0  ;;  %3831 = vtanh.f32 %v2214_v40 }
 0x181   :  { %v2202_v44 = vpop.f32.mrf.mxu1 }
 0x184   :  { %v2226_v45 = vpop.f32.mrf.mxu3 }
 0x185   :  { %v2215_v46 = vpop.f32.mrf.mxu2  ;;  %v2227_v56 = vadd.f32 %v2226_v45, %v421_v54 }
 0x186   :  { %v3832_v47 = vpop.eup %3831 }
 0x187   :  { %v2340_v48 = vmul.f32 0.5, %v3832_v47 }
 0x189   :  { %v2344_v49 = vadd.f32 0.5, %v2340_v48 }
 0x18b   :  { %2348 = vst [vmem:[#allocation10 + $0x10] sm:$0xff] %v2344_v49 }
 0x18c   :  { %v2228_v50 = vpop.f32.mrf.mxu3 }
 0x198   :  { %v2239_v51 = vpop.f32.mrf.mxu0 }
 0x199   :  { %v2252_v61 = vpop.f32.mrf.mxu1  ;;  %v2240_v58 = vadd.f32 %v2239_v51, %v2227_v56 }
 0x19b   :  { %v2253_v60 = vadd.f32 %v2252_v61, %v2240_v58 }
 0x19d   :  { %v2265_v52 = vpop.f32.mrf.mxu2 }
 0x19e   :  { %v2266_v62 = vadd.f32 %v2265_v52, %v2253_v60 }
 0x1a0   :  { %v2241_v53 = vpop.f32.mrf.mxu0 }
 0x1a1   :  { %v2254_v43 = vpop.f32.mrf.mxu1 }
 0x1a4   :  { %v2278_v55 = vpop.f32.mrf.mxu3 }
 0x1a5   :  { %v2267_v57 = vpop.f32.mrf.mxu2  ;;  %v2279_v0 = vadd.f32 %v2278_v55, %v2266_v62 }
 0x1ac   :  { %v2280_v59 = vpop.f32.mrf.mxu3 }
 0x1b8   :  { %v2291_v63 = vpop.f32.mrf.mxu0 }
 0x1b9   :  { %v2304_v1 = vpop.f32.mrf.mxu1  ;;  %v2292_v6 = vadd.f32 %v2291_v63, %v2279_v0 }
 0x1bb   :  { %v2305_v3 = vadd.f32 %v2304_v1, %v2292_v6 }
 0x1bd   :  { %v2317_v2 = vpop.f32.mrf.mxu2 }
 0x1be   :  { %v2318_v5 = vadd.f32 %v2317_v2, %v2305_v3 }
 0x1c0   :  { %v2293_v4 = vpop.f32.mrf.mxu0 }
 0x1c1   :  { %v2306_v7 = vpop.f32.mrf.mxu1 }
 0x1c4   :  { %v2330_v8 = vpop.f32.mrf.mxu3 }
 0x1c5   :  { %v2331_v9 = vadd.f32 %v2330_v8, %v2318_v5  ;;  %v2319_v25 = vpop.f32.mrf.mxu2 }
 0x1c7   :  { %3833 = vtanh.f32 %v2331_v9 }
 0x1cc   :  { %v2332_v32 = vpop.f32.mrf.mxu3 }
 0x1cd   :  { %v3834_v10 = vpop.eup %3833 }
 0x1ce   :  { %v2341_v11 = vmul.f32 0.5, %v3834_v10 }
 0x1d0   :  { %v2345_v41 = vadd.f32 0.5, %v2341_v11 }
 0x1d2   :  { %2349 = vst [vmem:[#allocation10 + $0x18] sm:$0xff] %v2345_v41 }
 0x1d3   :  { %2360 = dma.vmem_to_hbm [thread:$0]  %s2356_s13, 512, %s2358_s16, [#allocation4]  }
 0x1d4   :  { %3949 = dma.done.wait [#allocation4], 512  }
 0x1d5   :  { %3950 = vsyncadd [#allocation4], 4294966784 }
 0x1d6   :  { %2365 = vsyncpa [#allocation3], 1 }
 0x1d7   :  { %2366 = vsyncpa [#allocation8], 1 }
 0x1d8   :  { %2367 = vsyncpa [#allocation4], 1 }
 0x1d9   :  { %2368 = vsyncpa [#allocation5], 1 }

</bundles_post_ra>
